<compile_context>
chip_gen: v5e
topology: v5e:2x2
jax: 0.10.0
libtpu: 0.0.40
codegen_flags: <defaults>
</compile_context>

<pallas_src>
import functools

import jax
import jax.numpy as jnp
from jax.experimental import pallas as pl
from jax.experimental.pallas import tpu as pltpu

LANE = 128  # TPU lane width: hidden is zero-padded to a multiple of this.


def _round_up(x, m):
    return (x + m - 1) // m * m


# ----------------------------------------------------------------------------
# Pallas kernel: one LBL layer, both directions fused, one batch element per
# grid step.  Windowed sum -> Highway stack -> residual (layer_index != 0).
# ----------------------------------------------------------------------------
def _make_layer_kernel(seq, width, hp, n_highway, add_residual):
    """hp = lane-padded hidden size (multiple of 128)."""

    def kernel(fwin_ref, bwin_ref,          # (width+1,) window weights (SMEM)
               xf_ref, xb_ref,              # (1, seq+width, hp) padded activations
               fhw_w_ref, fhw_b_ref,        # forward Highway: (n_hw, hp, 2hp) bf16, (n_hw, 1, 2hp) f32
               bhw_w_ref, bhw_b_ref,        # backward Highway
               fout_ref, bout_ref):         # (1, seq, hp) f32 outputs
        # ---- windowed weighted sums (static unrolled, ref-sliced loads) ----
        # forward : padded_f = [fpad; x_f]  -> window for step t = rows [t, t+width]
        # backward: padded_b = [x_b ; bpad] -> window for step t = rows [t, t+width]
        x_f = xf_ref[0, width:width + seq, :]        # slice j=width; reused for residual
        acc_f = fwin_ref[width] * x_f
        for j in range(width):
            acc_f = acc_f + fwin_ref[j] * xf_ref[0, j:j + seq, :]

        x_b = xb_ref[0, 0:seq, :]                    # slice j=0; reused for residual
        acc_b = bwin_ref[0] * x_b
        for j in range(1, width + 1):
            acc_b = acc_b + bwin_ref[j] * xb_ref[0, j:j + seq, :]

        # ---- Highway stack: bf16 MXU matmuls with f32 accumulation ----
        def highway(cur, w_ref, b_ref):
            for k in range(n_highway):
                proj = jnp.dot(cur.astype(jnp.bfloat16), w_ref[k],
                               preferred_element_type=jnp.float32) + b_ref[k]
                nonlinear = jnp.maximum(proj[:, :hp], 0.0)
                # sigmoid = 1 / (1 + exp(-g)); exp + approx reciprocal -> EUP.
                gate = pl.reciprocal(1.0 + jnp.exp(-proj[:, hp:]), approx=True)
                cur = gate * cur + (1.0 - gate) * nonlinear
            return cur

        out_f = highway(acc_f, fhw_w_ref, fhw_b_ref)
        out_b = highway(acc_b, bhw_w_ref, bhw_b_ref)

        if add_residual:            # "if layer_index != 0: output += cache"
            out_f = out_f + x_f
            out_b = out_b + x_b

        fout_ref[0] = out_f
        bout_ref[0] = out_b

    return kernel


def _lbl_layer(padded_f, padded_b, f_win, b_win, f_hw_w, f_hw_b, b_hw_w, b_hw_b,
               *, width, n_highway, add_residual):
    """One layer, both directions.  padded_*: (batch, seq+width, hp)."""
    batch, seq_pw, hp = padded_f.shape
    seq = seq_pw - width
    hp2 = 2 * hp

    kernel = _make_layer_kernel(seq, width, hp, n_highway, add_residual)

    # Advisory cost estimate so XLA schedules the per-layer glue around us.
    mm_flops = 2 * n_highway * batch * (2 * seq * hp * hp2)
    win_flops = 2 * batch * (width + 1) * seq * hp * 2
    vpu_flops = 2 * n_highway * batch * seq * hp * 8
    transcendentals = 2 * n_highway * batch * seq * hp
    bytes_accessed = (2 * batch * seq_pw * hp * 4        # padded activations in
                      + 2 * n_highway * hp * hp2 * 2     # bf16 Highway weights
                      + 2 * n_highway * hp2 * 4          # Highway biases
                      + 2 * batch * seq * hp * 4)        # outputs

    return pl.pallas_call(
        kernel,
        out_shape=(jax.ShapeDtypeStruct((batch, seq, hp), jnp.float32),
                   jax.ShapeDtypeStruct((batch, seq, hp), jnp.float32)),
        grid=(batch,),
        in_specs=[
            pl.BlockSpec(memory_space=pltpu.MemorySpace.SMEM),        # f window weights
            pl.BlockSpec(memory_space=pltpu.MemorySpace.SMEM),        # b window weights
            pl.BlockSpec((1, seq_pw, hp), lambda b: (b, 0, 0)),       # padded_f
            pl.BlockSpec((1, seq_pw, hp), lambda b: (b, 0, 0)),       # padded_b
            pl.BlockSpec((n_highway, hp, hp2), lambda b: (0, 0, 0)),  # f Highway W (bf16)
            pl.BlockSpec((n_highway, 1, hp2), lambda b: (0, 0, 0)),   # f Highway b
            pl.BlockSpec((n_highway, hp, hp2), lambda b: (0, 0, 0)),  # b Highway W (bf16)
            pl.BlockSpec((n_highway, 1, hp2), lambda b: (0, 0, 0)),   # b Highway b
        ],
        out_specs=(pl.BlockSpec((1, seq, hp), lambda b: (b, 0, 0)),
                   pl.BlockSpec((1, seq, hp), lambda b: (b, 0, 0))),
        compiler_params=pltpu.CompilerParams(
            dimension_semantics=("parallel",),
            vmem_limit_bytes=48 * 1024 * 1024),
        cost_estimate=pl.CostEstimate(flops=int(mm_flops + win_flops + vpu_flops),
                                      transcendentals=int(transcendentals),
                                      bytes_accessed=int(bytes_accessed)),
    )(f_win, b_win, padded_f, padded_b, f_hw_w, f_hw_b, b_hw_w, b_hw_b)


# ----------------------------------------------------------------------------
# Parameters (deterministic init matching the PyTorch module's shapes) and the
# lane-padded / bf16 views fed to the kernel.
# ----------------------------------------------------------------------------
def init_params(key, width, hidden, n_layers, n_highway):
    ks = jax.random.split(key, 6)
    inv = 1.0 / jnp.sqrt(hidden)
    # Highway bias: nonlinear part 0, transform-gate part 1 (carry-biased).
    hw_bias = jnp.concatenate([jnp.zeros((hidden,)), jnp.ones((hidden,))])
    hw_bias = jnp.broadcast_to(hw_bias, (n_layers, n_highway, 2 * hidden))
    p = {
        "forward_paddings": jax.random.normal(ks[0], (n_layers, width, hidden)) * inv,
        "backward_paddings": jax.random.normal(ks[1], (n_layers, width, hidden)) * inv,
        "forward_weights": jax.random.normal(ks[2], (n_layers, width + 1)),
        "backward_weights": jax.random.normal(ks[3], (n_layers, width + 1)),
        # Highway weights stored (in, out) for y = x @ W + b;
        # columns [:hidden] = nonlinear projection, [hidden:] = transform gate.
        "f_hw_w": jax.random.normal(ks[4], (n_layers, n_highway, hidden, 2 * hidden)) * inv,
        "b_hw_w": jax.random.normal(ks[5], (n_layers, n_highway, hidden, 2 * hidden)) * inv,
        "f_hw_b": hw_bias,
        "b_hw_b": hw_bias,
    }
    return jax.tree.map(lambda a: jnp.asarray(a, jnp.float32), p)


def _prepare_kernel_params(params, hidden, hp):
    """Zero-pad hidden axes to hp (lane-dense) and cast Highway weights to bf16.

    Zero padding is exact: padded lanes stay 0 through the window sum and the
    Highway layers (gate=sigmoid(0)=0.5 mixes two zeros), and padded K rows of
    W are zero so they never feed into the real output columns."""
    pad = hp - hidden
    n_layers, n_hw = params["f_hw_w"].shape[:2]
    hp2 = 2 * hp

    def pad_last(a):
        return jnp.pad(a, [(0, 0)] * (a.ndim - 1) + [(0, pad)])

    def pad_hw_w(w):        # (L, n_hw, hidden, 2*hidden) -> (L, n_hw, hp, 2*hp) bf16
        out = jnp.zeros((n_layers, n_hw, hp, hp2), jnp.float32)
        out = out.at[:, :, :hidden, :hidden].set(w[..., :hidden])
        out = out.at[:, :, :hidden, hp:hp + hidden].set(w[..., hidden:])
        return out.astype(jnp.bfloat16)

    def pad_hw_b(b):        # (L, n_hw, 2*hidden) -> (L, n_hw, 1, 2*hp) f32
        out = jnp.zeros((n_layers, n_hw, 1, hp2), jnp.float32)
        out = out.at[:, :, 0, :hidden].set(b[..., :hidden])
        out = out.at[:, :, 0, hp:hp + hidden].set(b[..., hidden:])
        return out

    return {
        "fpad": pad_last(params["forward_paddings"]),
        "bpad": pad_last(params["backward_paddings"]),
        "f_hw_w": pad_hw_w(params["f_hw_w"]),
        "f_hw_b": pad_hw_b(params["f_hw_b"]),
        "b_hw_w": pad_hw_w(params["b_hw_w"]),
        "b_hw_b": pad_hw_b(params["b_hw_b"]),
    }


# ----------------------------------------------------------------------------
# Full module forward (thin JAX glue around the per-layer Pallas kernel).
# ----------------------------------------------------------------------------
def lbl_highway_bilm_forward(params, inputs, masks, *, width, n_layers, n_highway):
    """inputs: (batch, seq, hidden).  Returns (n_layers, batch, seq, 2*hidden)."""
    del masks  # accepted for API parity; unused by the PyTorch forward as well
    batch, seq, hidden = inputs.shape
    hp = _round_up(hidden, LANE)
    kp = _prepare_kernel_params(params, hidden, hp)

    x = jnp.pad(inputs.astype(jnp.float32), ((0, 0), (0, 0), (0, hp - hidden)))
    last_f = last_b = x
    outputs = []
    for i in range(n_layers):
        fpad = jnp.broadcast_to(kp["fpad"][i][None], (batch, width, hp))
        bpad = jnp.broadcast_to(kp["bpad"][i][None], (batch, width, hp))
        # Only the width-row halo is concatenated (no full padded copy + slice);
        # forward windows never read the back padding, backward never the front.
        padded_f = jnp.concatenate([fpad, last_f], axis=1)   # [fpad; x_f]
        padded_b = jnp.concatenate([last_b, bpad], axis=1)   # [x_b ; bpad]
        f_out, b_out = _lbl_layer(
            padded_f, padded_b,
            params["forward_weights"][i], params["backward_weights"][i],
            kp["f_hw_w"][i], kp["f_hw_b"][i], kp["b_hw_w"][i], kp["b_hw_b"][i],
            width=width, n_highway=n_highway, add_residual=(i != 0))
        last_f, last_b = f_out, b_out
        outputs.append(jnp.concatenate(
            [f_out[..., :hidden], b_out[..., :hidden]], axis=-1))
    return jnp.stack(outputs, axis=0)


# ----------------------------------------------------------------------------
# Pure-JAX reference (mirrors the PyTorch per-step loop) for validation.
# ----------------------------------------------------------------------------
def _highway_ref(x, Ws, Bs, hidden):
    cur = x
    for k in range(Ws.shape[0]):
        proj = cur @ Ws[k] + Bs[k]
        nonlinear = jnp.maximum(proj[..., :hidden], 0.0)
        gate = jax.nn.sigmoid(proj[..., hidden:])
        cur = gate * cur + (1.0 - gate) * nonlinear
    return cur


def reference_forward(params, inputs, width, n_layers, n_highway):
    batch, seq, hidden = inputs.shape
    f_seq = b_seq = inputs
    outs = []
    for i in range(n_layers):
        f_cache, b_cache = f_seq, b_seq
        fpad = jnp.broadcast_to(params["forward_paddings"][i], (batch, width, hidden))
        bpad = jnp.broadcast_to(params["backward_paddings"][i], (batch, width, hidden))
        padded_f = jnp.concatenate([fpad, f_seq, bpad], axis=1)
        padded_b = jnp.concatenate([fpad, b_seq, bpad], axis=1)
        f_steps, b_steps = [], []
        for start in range(seq):
            end = start + width
            f_in = padded_f[:, start:start + width + 1]
            f_y = jnp.einsum("bwh,w->bh", f_in, params["forward_weights"][i])
            f_y = _highway_ref(f_y, params["f_hw_w"][i], params["f_hw_b"][i], hidden)
            b_in = padded_b[:, end:end + width + 1]
            b_y = jnp.einsum("bwh,w->bh", b_in, params["backward_weights"][i])
            b_y = _highway_ref(b_y, params["b_hw_w"][i], params["b_hw_b"][i], hidden)
            f_steps.append(f_y)
            b_steps.append(b_y)
        f_seq = jnp.stack(f_steps, axis=1)
        b_seq = jnp.stack(b_steps, axis=1)
        if i != 0:
            f_seq = f_seq + f_cache
            b_seq = b_seq + b_cache
        outs.append(jnp.concatenate([f_seq, b_seq], axis=-1))
    return jnp.stack(outs, axis=0)


if __name__ == "__main__":
    width, hidden, n_layers, n_highway = 3, 32, 2, 2
    batch, seq = 2, 8
    input_size = hidden  # the module's forward requires dim == hidden_size

    key = jax.random.PRNGKey(0)
    k_params, k_inputs = jax.random.split(key)
    params = init_params(k_params, width, hidden, n_layers, n_highway)
    inputs = jax.random.normal(k_inputs, (batch, seq, input_size), jnp.float32)
    masks = jnp.ones((batch, seq), jnp.float32)  # unused by the forward pass

    fwd = jax.jit(functools.partial(lbl_highway_bilm_forward, width=width,
                                    n_layers=n_layers, n_highway=n_highway))
    out = jax.block_until_ready(fwd(params, inputs, masks))
    assert out.shape == (n_layers, batch, seq, 2 * hidden), out.shape

    ref = jax.block_until_ready(
        reference_forward(params, inputs, width, n_layers, n_highway))
    max_err = float(jnp.max(jnp.abs(out - ref)))
    # bf16 MXU inputs (f32 accumulation) + approx-reciprocal sigmoid perturb
    # the result at the ~1e-2 level vs. the pure-f32 reference.
    tol = 2e-2 * float(jnp.max(jnp.abs(ref))) + 5e-2
    assert max_err < tol, f"max abs err {max_err} exceeds tolerance {tol}"

    print("KERNEL_OK")
</pallas_src>

<mosaic_0001>
module attributes {stable_mosaic.version = 11 : i64} {
  func.func @kernel(%arg0: i32, %arg1: memref<4xf32, #tpu.memory_space<smem>>, %arg2: memref<4xf32, #tpu.memory_space<smem>>, %arg3: memref<1x11x128xf32, #tpu.memory_space<vmem>>, %arg4: memref<1x11x128xf32, #tpu.memory_space<vmem>>, %arg5: memref<2x128x256xbf16, #tpu.memory_space<vmem>>, %arg6: memref<2x1x256xf32, #tpu.memory_space<vmem>>, %arg7: memref<2x128x256xbf16, #tpu.memory_space<vmem>>, %arg8: memref<2x1x256xf32, #tpu.memory_space<vmem>>, %arg9: memref<1x8x128xf32, #tpu.memory_space<vmem>>, %arg10: memref<1x8x128xf32, #tpu.memory_space<vmem>>) attributes {dimension_semantics = [#tpu.dimension_semantics<parallel>], iteration_bounds = array<i64: 2>, scalar_prefetch = 0 : i64, scratch_operands = 0 : i64, tpu.core_type = #tpu.core_type<tc>, window_params = [{transform_indices = @transform_0, window_bounds = array<i64: 4>}, {transform_indices = @transform_1, window_bounds = array<i64: 4>}, {transform_indices = @transform_2, window_bounds = array<i64: 1, 11, 128>}, {transform_indices = @transform_3, window_bounds = array<i64: 1, 11, 128>}, {pipeline_mode = #tpu.pipeline_mode<synchronous>, transform_indices = @transform_4, window_bounds = array<i64: 2, 128, 256>}, {pipeline_mode = #tpu.pipeline_mode<synchronous>, transform_indices = @transform_5, window_bounds = array<i64: 2, 1, 256>}, {pipeline_mode = #tpu.pipeline_mode<synchronous>, transform_indices = @transform_6, window_bounds = array<i64: 2, 128, 256>}, {pipeline_mode = #tpu.pipeline_mode<synchronous>, transform_indices = @transform_7, window_bounds = array<i64: 2, 1, 256>}, {transform_indices = @transform_8, window_bounds = array<i64: 1, 8, 128>}, {transform_indices = @transform_9, window_bounds = array<i64: 1, 8, 128>}]} {
    %c0 = arith.constant 0 : index
    %c3 = arith.constant 3 : index
    %c0_0 = arith.constant 0 : index
    %0 = vector.load %arg3[%c0, %c3, %c0_0] : memref<1x11x128xf32, #tpu.memory_space<vmem>>, vector<1x8x128xf32>
    %1 = vector.shape_cast %0 : vector<1x8x128xf32> to vector<8x128xf32>
    %c3_1 = arith.constant 3 : index
    %2 = memref.load %arg1[%c3_1] : memref<4xf32, #tpu.memory_space<smem>>
    %3 = vector.broadcast %2 : f32 to vector<8x128xf32>
    %4 = arith.mulf %3, %1 : vector<8x128xf32>
    %c0_2 = arith.constant 0 : index
    %5 = memref.load %arg1[%c0_2] : memref<4xf32, #tpu.memory_space<smem>>
    %c0_3 = arith.constant 0 : index
    %c0_4 = arith.constant 0 : index
    %c0_5 = arith.constant 0 : index
    %6 = vector.load %arg3[%c0_3, %c0_4, %c0_5] : memref<1x11x128xf32, #tpu.memory_space<vmem>>, vector<1x8x128xf32>
    %7 = vector.shape_cast %6 : vector<1x8x128xf32> to vector<8x128xf32>
    %8 = vector.broadcast %5 : f32 to vector<8x128xf32>
    %9 = arith.mulf %8, %7 : vector<8x128xf32>
    %10 = arith.addf %4, %9 : vector<8x128xf32>
    %c1 = arith.constant 1 : index
    %11 = memref.load %arg1[%c1] : memref<4xf32, #tpu.memory_space<smem>>
    %c0_6 = arith.constant 0 : index
    %c1_7 = arith.constant 1 : index
    %c0_8 = arith.constant 0 : index
    %12 = vector.load %arg3[%c0_6, %c1_7, %c0_8] : memref<1x11x128xf32, #tpu.memory_space<vmem>>, vector<1x8x128xf32>
    %13 = vector.shape_cast %12 : vector<1x8x128xf32> to vector<8x128xf32>
    %14 = vector.broadcast %11 : f32 to vector<8x128xf32>
    %15 = arith.mulf %14, %13 : vector<8x128xf32>
    %16 = arith.addf %10, %15 : vector<8x128xf32>
    %c2 = arith.constant 2 : index
    %17 = memref.load %arg1[%c2] : memref<4xf32, #tpu.memory_space<smem>>
    %c0_9 = arith.constant 0 : index
    %c2_10 = arith.constant 2 : index
    %c0_11 = arith.constant 0 : index
    %18 = vector.load %arg3[%c0_9, %c2_10, %c0_11] : memref<1x11x128xf32, #tpu.memory_space<vmem>>, vector<1x8x128xf32>
    %19 = vector.shape_cast %18 : vector<1x8x128xf32> to vector<8x128xf32>
    %20 = vector.broadcast %17 : f32 to vector<8x128xf32>
    %21 = arith.mulf %20, %19 : vector<8x128xf32>
    %22 = arith.addf %16, %21 : vector<8x128xf32>
    %c0_12 = arith.constant 0 : index
    %c0_13 = arith.constant 0 : index
    %c0_14 = arith.constant 0 : index
    %23 = vector.load %arg4[%c0_12, %c0_13, %c0_14] : memref<1x11x128xf32, #tpu.memory_space<vmem>>, vector<1x8x128xf32>
    %24 = vector.shape_cast %23 : vector<1x8x128xf32> to vector<8x128xf32>
    %c0_15 = arith.constant 0 : index
    %25 = memref.load %arg2[%c0_15] : memref<4xf32, #tpu.memory_space<smem>>
    %26 = vector.broadcast %25 : f32 to vector<8x128xf32>
    %27 = arith.mulf %26, %24 : vector<8x128xf32>
    %c1_16 = arith.constant 1 : index
    %28 = memref.load %arg2[%c1_16] : memref<4xf32, #tpu.memory_space<smem>>
    %c0_17 = arith.constant 0 : index
    %c1_18 = arith.constant 1 : index
    %c0_19 = arith.constant 0 : index
    %29 = vector.load %arg4[%c0_17, %c1_18, %c0_19] : memref<1x11x128xf32, #tpu.memory_space<vmem>>, vector<1x8x128xf32>
    %30 = vector.shape_cast %29 : vector<1x8x128xf32> to vector<8x128xf32>
    %31 = vector.broadcast %28 : f32 to vector<8x128xf32>
    %32 = arith.mulf %31, %30 : vector<8x128xf32>
    %33 = arith.addf %27, %32 : vector<8x128xf32>
    %c2_20 = arith.constant 2 : index
    %34 = memref.load %arg2[%c2_20] : memref<4xf32, #tpu.memory_space<smem>>
    %c0_21 = arith.constant 0 : index
    %c2_22 = arith.constant 2 : index
    %c0_23 = arith.constant 0 : index
    %35 = vector.load %arg4[%c0_21, %c2_22, %c0_23] : memref<1x11x128xf32, #tpu.memory_space<vmem>>, vector<1x8x128xf32>
    %36 = vector.shape_cast %35 : vector<1x8x128xf32> to vector<8x128xf32>
    %37 = vector.broadcast %34 : f32 to vector<8x128xf32>
    %38 = arith.mulf %37, %36 : vector<8x128xf32>
    %39 = arith.addf %33, %38 : vector<8x128xf32>
    %c3_24 = arith.constant 3 : index
    %40 = memref.load %arg2[%c3_24] : memref<4xf32, #tpu.memory_space<smem>>
    %c0_25 = arith.constant 0 : index
    %c3_26 = arith.constant 3 : index
    %c0_27 = arith.constant 0 : index
    %41 = vector.load %arg4[%c0_25, %c3_26, %c0_27] : memref<1x11x128xf32, #tpu.memory_space<vmem>>, vector<1x8x128xf32>
    %42 = vector.shape_cast %41 : vector<1x8x128xf32> to vector<8x128xf32>
    %43 = vector.broadcast %40 : f32 to vector<8x128xf32>
    %44 = arith.mulf %43, %42 : vector<8x128xf32>
    %45 = arith.addf %39, %44 : vector<8x128xf32>
    %46 = arith.truncf %22 : vector<8x128xf32> to vector<8x128xbf16>
    %c0_28 = arith.constant 0 : index
    %c0_29 = arith.constant 0 : index
    %c0_30 = arith.constant 0 : index
    %47 = vector.load %arg5[%c0_28, %c0_29, %c0_30] : memref<2x128x256xbf16, #tpu.memory_space<vmem>>, vector<1x128x256xbf16>
    %48 = vector.shape_cast %47 : vector<1x128x256xbf16> to vector<128x256xbf16>
    %cst = arith.constant dense<0.000000e+00> : vector<8x256xf32>
    %49 = tpu.matmul %46, %48, %cst {dimension_numbers = #tpu.dot_dimension_numbers<[1], [0], [0], [1], [0, 0, 1, 1], [], []>} : vector<8x128xbf16>, vector<128x256xbf16>, vector<8x256xf32> -> vector<8x256xf32>
    %c0_31 = arith.constant 0 : index
    %c0_32 = arith.constant 0 : index
    %c0_33 = arith.constant 0 : index
    %50 = vector.load %arg6[%c0_31, %c0_32, %c0_33] : memref<2x1x256xf32, #tpu.memory_space<vmem>>, vector<1x1x256xf32>
    %51 = vector.shape_cast %50 : vector<1x1x256xf32> to vector<1x256xf32>
    %52 = vector.broadcast %51 : vector<1x256xf32> to vector<8x256xf32>
    %53 = arith.addf %49, %52 : vector<8x256xf32>
    %54 = vector.extract_strided_slice %53 {offsets = [0, 0], sizes = [8, 128], strides = [1, 1]} : vector<8x256xf32> to vector<8x128xf32>
    %cst_34 = arith.constant 0.000000e+00 : f32
    %55 = vector.broadcast %cst_34 : f32 to vector<8x128xf32>
    %56 = arith.maximumf %54, %55 : vector<8x128xf32>
    %57 = vector.extract_strided_slice %53 {offsets = [0, 128], sizes = [8, 128], strides = [1, 1]} : vector<8x256xf32> to vector<8x128xf32>
    %cst_35 = arith.constant 0.000000e+00 : f32
    %58 = vector.broadcast %cst_35 : f32 to vector<8x128xf32>
    %59 = arith.subf %58, %57 : vector<8x128xf32>
    %60 = math.exp %59 : vector<8x128xf32>
    %cst_36 = arith.constant 1.000000e+00 : f32
    %61 = vector.broadcast %cst_36 : f32 to vector<8x128xf32>
    %62 = arith.addf %61, %60 : vector<8x128xf32>
    %63 = tpu.reciprocal %62 {approx = true} : vector<8x128xf32> -> vector<8x128xf32>
    %64 = arith.mulf %63, %22 : vector<8x128xf32>
    %cst_37 = arith.constant 1.000000e+00 : f32
    %65 = vector.broadcast %cst_37 : f32 to vector<8x128xf32>
    %66 = arith.subf %65, %63 : vector<8x128xf32>
    %67 = arith.mulf %66, %56 : vector<8x128xf32>
    %68 = arith.addf %64, %67 : vector<8x128xf32>
    %69 = arith.truncf %68 : vector<8x128xf32> to vector<8x128xbf16>
    %c1_38 = arith.constant 1 : index
    %c0_39 = arith.constant 0 : index
    %c0_40 = arith.constant 0 : index
    %70 = vector.load %arg5[%c1_38, %c0_39, %c0_40] : memref<2x128x256xbf16, #tpu.memory_space<vmem>>, vector<1x128x256xbf16>
    %71 = vector.shape_cast %70 : vector<1x128x256xbf16> to vector<128x256xbf16>
    %cst_41 = arith.constant dense<0.000000e+00> : vector<8x256xf32>
    %72 = tpu.matmul %69, %71, %cst_41 {dimension_numbers = #tpu.dot_dimension_numbers<[1], [0], [0], [1], [0, 0, 1, 1], [], []>} : vector<8x128xbf16>, vector<128x256xbf16>, vector<8x256xf32> -> vector<8x256xf32>
    %c1_42 = arith.constant 1 : index
    %c0_43 = arith.constant 0 : index
    %c0_44 = arith.constant 0 : index
    %73 = vector.load %arg6[%c1_42, %c0_43, %c0_44] : memref<2x1x256xf32, #tpu.memory_space<vmem>>, vector<1x1x256xf32>
    %74 = vector.shape_cast %73 : vector<1x1x256xf32> to vector<1x256xf32>
    %75 = vector.broadcast %74 : vector<1x256xf32> to vector<8x256xf32>
    %76 = arith.addf %72, %75 : vector<8x256xf32>
    %77 = vector.extract_strided_slice %76 {offsets = [0, 0], sizes = [8, 128], strides = [1, 1]} : vector<8x256xf32> to vector<8x128xf32>
    %cst_45 = arith.constant 0.000000e+00 : f32
    %78 = vector.broadcast %cst_45 : f32 to vector<8x128xf32>
    %79 = arith.maximumf %77, %78 : vector<8x128xf32>
    %80 = vector.extract_strided_slice %76 {offsets = [0, 128], sizes = [8, 128], strides = [1, 1]} : vector<8x256xf32> to vector<8x128xf32>
    %cst_46 = arith.constant 0.000000e+00 : f32
    %81 = vector.broadcast %cst_46 : f32 to vector<8x128xf32>
    %82 = arith.subf %81, %80 : vector<8x128xf32>
    %83 = math.exp %82 : vector<8x128xf32>
    %cst_47 = arith.constant 1.000000e+00 : f32
    %84 = vector.broadcast %cst_47 : f32 to vector<8x128xf32>
    %85 = arith.addf %84, %83 : vector<8x128xf32>
    %86 = tpu.reciprocal %85 {approx = true} : vector<8x128xf32> -> vector<8x128xf32>
    %87 = arith.mulf %86, %68 : vector<8x128xf32>
    %cst_48 = arith.constant 1.000000e+00 : f32
    %88 = vector.broadcast %cst_48 : f32 to vector<8x128xf32>
    %89 = arith.subf %88, %86 : vector<8x128xf32>
    %90 = arith.mulf %89, %79 : vector<8x128xf32>
    %91 = arith.addf %87, %90 : vector<8x128xf32>
    %92 = arith.truncf %45 : vector<8x128xf32> to vector<8x128xbf16>
    %c0_49 = arith.constant 0 : index
    %c0_50 = arith.constant 0 : index
    %c0_51 = arith.constant 0 : index
    %93 = vector.load %arg7[%c0_49, %c0_50, %c0_51] : memref<2x128x256xbf16, #tpu.memory_space<vmem>>, vector<1x128x256xbf16>
    %94 = vector.shape_cast %93 : vector<1x128x256xbf16> to vector<128x256xbf16>
    %cst_52 = arith.constant dense<0.000000e+00> : vector<8x256xf32>
    %95 = tpu.matmul %92, %94, %cst_52 {dimension_numbers = #tpu.dot_dimension_numbers<[1], [0], [0], [1], [0, 0, 1, 1], [], []>} : vector<8x128xbf16>, vector<128x256xbf16>, vector<8x256xf32> -> vector<8x256xf32>
    %c0_53 = arith.constant 0 : index
    %c0_54 = arith.constant 0 : index
    %c0_55 = arith.constant 0 : index
    %96 = vector.load %arg8[%c0_53, %c0_54, %c0_55] : memref<2x1x256xf32, #tpu.memory_space<vmem>>, vector<1x1x256xf32>
    %97 = vector.shape_cast %96 : vector<1x1x256xf32> to vector<1x256xf32>
    %98 = vector.broadcast %97 : vector<1x256xf32> to vector<8x256xf32>
    %99 = arith.addf %95, %98 : vector<8x256xf32>
    %100 = vector.extract_strided_slice %99 {offsets = [0, 0], sizes = [8, 128], strides = [1, 1]} : vector<8x256xf32> to vector<8x128xf32>
    %cst_56 = arith.constant 0.000000e+00 : f32
    %101 = vector.broadcast %cst_56 : f32 to vector<8x128xf32>
    %102 = arith.maximumf %100, %101 : vector<8x128xf32>
    %103 = vector.extract_strided_slice %99 {offsets = [0, 128], sizes = [8, 128], strides = [1, 1]} : vector<8x256xf32> to vector<8x128xf32>
    %cst_57 = arith.constant 0.000000e+00 : f32
    %104 = vector.broadcast %cst_57 : f32 to vector<8x128xf32>
    %105 = arith.subf %104, %103 : vector<8x128xf32>
    %106 = math.exp %105 : vector<8x128xf32>
    %cst_58 = arith.constant 1.000000e+00 : f32
    %107 = vector.broadcast %cst_58 : f32 to vector<8x128xf32>
    %108 = arith.addf %107, %106 : vector<8x128xf32>
    %109 = tpu.reciprocal %108 {approx = true} : vector<8x128xf32> -> vector<8x128xf32>
    %110 = arith.mulf %109, %45 : vector<8x128xf32>
    %cst_59 = arith.constant 1.000000e+00 : f32
    %111 = vector.broadcast %cst_59 : f32 to vector<8x128xf32>
    %112 = arith.subf %111, %109 : vector<8x128xf32>
    %113 = arith.mulf %112, %102 : vector<8x128xf32>
    %114 = arith.addf %110, %113 : vector<8x128xf32>
    %115 = arith.truncf %114 : vector<8x128xf32> to vector<8x128xbf16>
    %c1_60 = arith.constant 1 : index
    %c0_61 = arith.constant 0 : index
    %c0_62 = arith.constant 0 : index
    %116 = vector.load %arg7[%c1_60, %c0_61, %c0_62] : memref<2x128x256xbf16, #tpu.memory_space<vmem>>, vector<1x128x256xbf16>
    %117 = vector.shape_cast %116 : vector<1x128x256xbf16> to vector<128x256xbf16>
    %cst_63 = arith.constant dense<0.000000e+00> : vector<8x256xf32>
    %118 = tpu.matmul %115, %117, %cst_63 {dimension_numbers = #tpu.dot_dimension_numbers<[1], [0], [0], [1], [0, 0, 1, 1], [], []>} : vector<8x128xbf16>, vector<128x256xbf16>, vector<8x256xf32> -> vector<8x256xf32>
    %c1_64 = arith.constant 1 : index
    %c0_65 = arith.constant 0 : index
    %c0_66 = arith.constant 0 : index
    %119 = vector.load %arg8[%c1_64, %c0_65, %c0_66] : memref<2x1x256xf32, #tpu.memory_space<vmem>>, vector<1x1x256xf32>
    %120 = vector.shape_cast %119 : vector<1x1x256xf32> to vector<1x256xf32>
    %121 = vector.broadcast %120 : vector<1x256xf32> to vector<8x256xf32>
    %122 = arith.addf %118, %121 : vector<8x256xf32>
    %123 = vector.extract_strided_slice %122 {offsets = [0, 0], sizes = [8, 128], strides = [1, 1]} : vector<8x256xf32> to vector<8x128xf32>
    %cst_67 = arith.constant 0.000000e+00 : f32
    %124 = vector.broadcast %cst_67 : f32 to vector<8x128xf32>
    %125 = arith.maximumf %123, %124 : vector<8x128xf32>
    %126 = vector.extract_strided_slice %122 {offsets = [0, 128], sizes = [8, 128], strides = [1, 1]} : vector<8x256xf32> to vector<8x128xf32>
    %cst_68 = arith.constant 0.000000e+00 : f32
    %127 = vector.broadcast %cst_68 : f32 to vector<8x128xf32>
    %128 = arith.subf %127, %126 : vector<8x128xf32>
    %129 = math.exp %128 : vector<8x128xf32>
    %cst_69 = arith.constant 1.000000e+00 : f32
    %130 = vector.broadcast %cst_69 : f32 to vector<8x128xf32>
    %131 = arith.addf %130, %129 : vector<8x128xf32>
    %132 = tpu.reciprocal %131 {approx = true} : vector<8x128xf32> -> vector<8x128xf32>
    %133 = arith.mulf %132, %114 : vector<8x128xf32>
    %cst_70 = arith.constant 1.000000e+00 : f32
    %134 = vector.broadcast %cst_70 : f32 to vector<8x128xf32>
    %135 = arith.subf %134, %132 : vector<8x128xf32>
    %136 = arith.mulf %135, %125 : vector<8x128xf32>
    %137 = arith.addf %133, %136 : vector<8x128xf32>
    %c0_71 = arith.constant 0 : index
    %c0_72 = arith.constant 0 : index
    %c0_73 = arith.constant 0 : index
    %138 = vector.load %arg9[%c0_71, %c0_72, %c0_73] : memref<1x8x128xf32, #tpu.memory_space<vmem>>, vector<1x8x128xf32>
    %139 = vector.shape_cast %138 : vector<1x8x128xf32> to vector<8x128xf32>
    %140 = vector.shape_cast %91 : vector<8x128xf32> to vector<1x8x128xf32>
    tpu.vector_store %arg9[%c0_71, %c0_72, %c0_73], %140 {strides = array<i32>} : memref<1x8x128xf32, #tpu.memory_space<vmem>>, vector<1x8x128xf32>,
    %c0_74 = arith.constant 0 : index
    %c0_75 = arith.constant 0 : index
    %c0_76 = arith.constant 0 : index
    %141 = vector.load %arg10[%c0_74, %c0_75, %c0_76] : memref<1x8x128xf32, #tpu.memory_space<vmem>>, vector<1x8x128xf32>
    %142 = vector.shape_cast %141 : vector<1x8x128xf32> to vector<8x128xf32>
    %143 = vector.shape_cast %137 : vector<8x128xf32> to vector<1x8x128xf32>
    tpu.vector_store %arg10[%c0_74, %c0_75, %c0_76], %143 {strides = array<i32>} : memref<1x8x128xf32, #tpu.memory_space<vmem>>, vector<1x8x128xf32>,
    return
  }
  func.func @transform_0(%arg0: i32) -> i32 {
    %c0_i32 = arith.constant 0 : i32
    %c0_i32_0 = arith.constant 0 : i32
    return %c0_i32 : i32
  }
  func.func @transform_1(%arg0: i32) -> i32 {
    %c0_i32 = arith.constant 0 : i32
    %c0_i32_0 = arith.constant 0 : i32
    return %c0_i32 : i32
  }
  func.func @transform_2(%arg0: i32) -> (i32, i32, i32) {
    %c0_i32 = arith.constant 0 : i32
    %c0_i32_0 = arith.constant 0 : i32
    %c0_i32_1 = arith.constant 0 : i32
    return %arg0, %c0_i32, %c0_i32_0 : i32, i32, i32
  }
  func.func @transform_3(%arg0: i32) -> (i32, i32, i32) {
    %c0_i32 = arith.constant 0 : i32
    %c0_i32_0 = arith.constant 0 : i32
    %c0_i32_1 = arith.constant 0 : i32
    return %arg0, %c0_i32, %c0_i32_0 : i32, i32, i32
  }
  func.func @transform_4(%arg0: i32) -> (i32, i32, i32) {
    %c0_i32 = arith.constant 0 : i32
    %c0_i32_0 = arith.constant 0 : i32
    %c0_i32_1 = arith.constant 0 : i32
    %c0_i32_2 = arith.constant 0 : i32
    return %c0_i32, %c0_i32_0, %c0_i32_1 : i32, i32, i32
  }
  func.func @transform_5(%arg0: i32) -> (i32, i32, i32) {
    %c0_i32 = arith.constant 0 : i32
    %c0_i32_0 = arith.constant 0 : i32
    %c0_i32_1 = arith.constant 0 : i32
    %c0_i32_2 = arith.constant 0 : i32
    return %c0_i32, %c0_i32_0, %c0_i32_1 : i32, i32, i32
  }
  func.func @transform_6(%arg0: i32) -> (i32, i32, i32) {
    %c0_i32 = arith.constant 0 : i32
    %c0_i32_0 = arith.constant 0 : i32
    %c0_i32_1 = arith.constant 0 : i32
    %c0_i32_2 = arith.constant 0 : i32
    return %c0_i32, %c0_i32_0, %c0_i32_1 : i32, i32, i32
  }
  func.func @transform_7(%arg0: i32) -> (i32, i32, i32) {
    %c0_i32 = arith.constant 0 : i32
    %c0_i32_0 = arith.constant 0 : i32
    %c0_i32_1 = arith.constant 0 : i32
    %c0_i32_2 = arith.constant 0 : i32
    return %c0_i32, %c0_i32_0, %c0_i32_1 : i32, i32, i32
  }
  func.func @transform_8(%arg0: i32) -> (i32, i32, i32) {
    %c0_i32 = arith.constant 0 : i32
    %c0_i32_0 = arith.constant 0 : i32
    %c0_i32_1 = arith.constant 0 : i32
    return %arg0, %c0_i32, %c0_i32_0 : i32, i32, i32
  }
  func.func @transform_9(%arg0: i32) -> (i32, i32, i32) {
    %c0_i32 = arith.constant 0 : i32
    %c0_i32_0 = arith.constant 0 : i32
    %c0_i32_1 = arith.constant 0 : i32
    return %arg0, %c0_i32, %c0_i32_0 : i32, i32, i32
  }
}

module attributes {stable_mosaic.version = 11 : i64} {
  func.func @kernel(%arg0: i32, %arg1: memref<4xf32, #tpu.memory_space<smem>>, %arg2: memref<4xf32, #tpu.memory_space<smem>>, %arg3: memref<1x11x128xf32, #tpu.memory_space<vmem>>, %arg4: memref<1x11x128xf32, #tpu.memory_space<vmem>>, %arg5: memref<2x128x256xbf16, #tpu.memory_space<vmem>>, %arg6: memref<2x1x256xf32, #tpu.memory_space<vmem>>, %arg7: memref<2x128x256xbf16, #tpu.memory_space<vmem>>, %arg8: memref<2x1x256xf32, #tpu.memory_space<vmem>>, %arg9: memref<1x8x128xf32, #tpu.memory_space<vmem>>, %arg10: memref<1x8x128xf32, #tpu.memory_space<vmem>>) attributes {dimension_semantics = [#tpu.dimension_semantics<parallel>], iteration_bounds = array<i64: 2>, scalar_prefetch = 0 : i64, scratch_operands = 0 : i64, tpu.core_type = #tpu.core_type<tc>, window_params = [{transform_indices = @transform_0, window_bounds = array<i64: 4>}, {transform_indices = @transform_1, window_bounds = array<i64: 4>}, {transform_indices = @transform_2, window_bounds = array<i64: 1, 11, 128>}, {transform_indices = @transform_3, window_bounds = array<i64: 1, 11, 128>}, {pipeline_mode = #tpu.pipeline_mode<synchronous>, transform_indices = @transform_4, window_bounds = array<i64: 2, 128, 256>}, {pipeline_mode = #tpu.pipeline_mode<synchronous>, transform_indices = @transform_5, window_bounds = array<i64: 2, 1, 256>}, {pipeline_mode = #tpu.pipeline_mode<synchronous>, transform_indices = @transform_6, window_bounds = array<i64: 2, 128, 256>}, {pipeline_mode = #tpu.pipeline_mode<synchronous>, transform_indices = @transform_7, window_bounds = array<i64: 2, 1, 256>}, {transform_indices = @transform_8, window_bounds = array<i64: 1, 8, 128>}, {transform_indices = @transform_9, window_bounds = array<i64: 1, 8, 128>}]} {
    %c0 = arith.constant 0 : index
    %c3 = arith.constant 3 : index
    %c0_0 = arith.constant 0 : index
    %0 = vector.load %arg3[%c0, %c3, %c0_0] : memref<1x11x128xf32, #tpu.memory_space<vmem>>, vector<1x8x128xf32>
    %1 = vector.shape_cast %0 : vector<1x8x128xf32> to vector<8x128xf32>
    %c3_1 = arith.constant 3 : index
    %2 = memref.load %arg1[%c3_1] : memref<4xf32, #tpu.memory_space<smem>>
    %3 = vector.broadcast %2 : f32 to vector<8x128xf32>
    %4 = arith.mulf %3, %1 : vector<8x128xf32>
    %c0_2 = arith.constant 0 : index
    %5 = memref.load %arg1[%c0_2] : memref<4xf32, #tpu.memory_space<smem>>
    %c0_3 = arith.constant 0 : index
    %c0_4 = arith.constant 0 : index
    %c0_5 = arith.constant 0 : index
    %6 = vector.load %arg3[%c0_3, %c0_4, %c0_5] : memref<1x11x128xf32, #tpu.memory_space<vmem>>, vector<1x8x128xf32>
    %7 = vector.shape_cast %6 : vector<1x8x128xf32> to vector<8x128xf32>
    %8 = vector.broadcast %5 : f32 to vector<8x128xf32>
    %9 = arith.mulf %8, %7 : vector<8x128xf32>
    %10 = arith.addf %4, %9 : vector<8x128xf32>
    %c1 = arith.constant 1 : index
    %11 = memref.load %arg1[%c1] : memref<4xf32, #tpu.memory_space<smem>>
    %c0_6 = arith.constant 0 : index
    %c1_7 = arith.constant 1 : index
    %c0_8 = arith.constant 0 : index
    %12 = vector.load %arg3[%c0_6, %c1_7, %c0_8] : memref<1x11x128xf32, #tpu.memory_space<vmem>>, vector<1x8x128xf32>
    %13 = vector.shape_cast %12 : vector<1x8x128xf32> to vector<8x128xf32>
    %14 = vector.broadcast %11 : f32 to vector<8x128xf32>
    %15 = arith.mulf %14, %13 : vector<8x128xf32>
    %16 = arith.addf %10, %15 : vector<8x128xf32>
    %c2 = arith.constant 2 : index
    %17 = memref.load %arg1[%c2] : memref<4xf32, #tpu.memory_space<smem>>
    %c0_9 = arith.constant 0 : index
    %c2_10 = arith.constant 2 : index
    %c0_11 = arith.constant 0 : index
    %18 = vector.load %arg3[%c0_9, %c2_10, %c0_11] : memref<1x11x128xf32, #tpu.memory_space<vmem>>, vector<1x8x128xf32>
    %19 = vector.shape_cast %18 : vector<1x8x128xf32> to vector<8x128xf32>
    %20 = vector.broadcast %17 : f32 to vector<8x128xf32>
    %21 = arith.mulf %20, %19 : vector<8x128xf32>
    %22 = arith.addf %16, %21 : vector<8x128xf32>
    %c0_12 = arith.constant 0 : index
    %c0_13 = arith.constant 0 : index
    %c0_14 = arith.constant 0 : index
    %23 = vector.load %arg4[%c0_12, %c0_13, %c0_14] : memref<1x11x128xf32, #tpu.memory_space<vmem>>, vector<1x8x128xf32>
    %24 = vector.shape_cast %23 : vector<1x8x128xf32> to vector<8x128xf32>
    %c0_15 = arith.constant 0 : index
    %25 = memref.load %arg2[%c0_15] : memref<4xf32, #tpu.memory_space<smem>>
    %26 = vector.broadcast %25 : f32 to vector<8x128xf32>
    %27 = arith.mulf %26, %24 : vector<8x128xf32>
    %c1_16 = arith.constant 1 : index
    %28 = memref.load %arg2[%c1_16] : memref<4xf32, #tpu.memory_space<smem>>
    %c0_17 = arith.constant 0 : index
    %c1_18 = arith.constant 1 : index
    %c0_19 = arith.constant 0 : index
    %29 = vector.load %arg4[%c0_17, %c1_18, %c0_19] : memref<1x11x128xf32, #tpu.memory_space<vmem>>, vector<1x8x128xf32>
    %30 = vector.shape_cast %29 : vector<1x8x128xf32> to vector<8x128xf32>
    %31 = vector.broadcast %28 : f32 to vector<8x128xf32>
    %32 = arith.mulf %31, %30 : vector<8x128xf32>
    %33 = arith.addf %27, %32 : vector<8x128xf32>
    %c2_20 = arith.constant 2 : index
    %34 = memref.load %arg2[%c2_20] : memref<4xf32, #tpu.memory_space<smem>>
    %c0_21 = arith.constant 0 : index
    %c2_22 = arith.constant 2 : index
    %c0_23 = arith.constant 0 : index
    %35 = vector.load %arg4[%c0_21, %c2_22, %c0_23] : memref<1x11x128xf32, #tpu.memory_space<vmem>>, vector<1x8x128xf32>
    %36 = vector.shape_cast %35 : vector<1x8x128xf32> to vector<8x128xf32>
    %37 = vector.broadcast %34 : f32 to vector<8x128xf32>
    %38 = arith.mulf %37, %36 : vector<8x128xf32>
    %39 = arith.addf %33, %38 : vector<8x128xf32>
    %c3_24 = arith.constant 3 : index
    %40 = memref.load %arg2[%c3_24] : memref<4xf32, #tpu.memory_space<smem>>
    %c0_25 = arith.constant 0 : index
    %c3_26 = arith.constant 3 : index
    %c0_27 = arith.constant 0 : index
    %41 = vector.load %arg4[%c0_25, %c3_26, %c0_27] : memref<1x11x128xf32, #tpu.memory_space<vmem>>, vector<1x8x128xf32>
    %42 = vector.shape_cast %41 : vector<1x8x128xf32> to vector<8x128xf32>
    %43 = vector.broadcast %40 : f32 to vector<8x128xf32>
    %44 = arith.mulf %43, %42 : vector<8x128xf32>
    %45 = arith.addf %39, %44 : vector<8x128xf32>
    %46 = arith.truncf %22 : vector<8x128xf32> to vector<8x128xbf16>
    %c0_28 = arith.constant 0 : index
    %c0_29 = arith.constant 0 : index
    %c0_30 = arith.constant 0 : index
    %47 = vector.load %arg5[%c0_28, %c0_29, %c0_30] : memref<2x128x256xbf16, #tpu.memory_space<vmem>>, vector<1x128x256xbf16>
    %48 = vector.shape_cast %47 : vector<1x128x256xbf16> to vector<128x256xbf16>
    %cst = arith.constant dense<0.000000e+00> : vector<8x256xf32>
    %49 = tpu.matmul %46, %48, %cst {dimension_numbers = #tpu.dot_dimension_numbers<[1], [0], [0], [1], [0, 0, 1, 1], [], []>} : vector<8x128xbf16>, vector<128x256xbf16>, vector<8x256xf32> -> vector<8x256xf32>
    %c0_31 = arith.constant 0 : index
    %c0_32 = arith.constant 0 : index
    %c0_33 = arith.constant 0 : index
    %50 = vector.load %arg6[%c0_31, %c0_32, %c0_33] : memref<2x1x256xf32, #tpu.memory_space<vmem>>, vector<1x1x256xf32>
    %51 = vector.shape_cast %50 : vector<1x1x256xf32> to vector<1x256xf32>
    %52 = vector.broadcast %51 : vector<1x256xf32> to vector<8x256xf32>
    %53 = arith.addf %49, %52 : vector<8x256xf32>
    %54 = vector.extract_strided_slice %53 {offsets = [0, 0], sizes = [8, 128], strides = [1, 1]} : vector<8x256xf32> to vector<8x128xf32>
    %cst_34 = arith.constant 0.000000e+00 : f32
    %55 = vector.broadcast %cst_34 : f32 to vector<8x128xf32>
    %56 = arith.maximumf %54, %55 : vector<8x128xf32>
    %57 = vector.extract_strided_slice %53 {offsets = [0, 128], sizes = [8, 128], strides = [1, 1]} : vector<8x256xf32> to vector<8x128xf32>
    %cst_35 = arith.constant 0.000000e+00 : f32
    %58 = vector.broadcast %cst_35 : f32 to vector<8x128xf32>
    %59 = arith.subf %58, %57 : vector<8x128xf32>
    %60 = math.exp %59 : vector<8x128xf32>
    %cst_36 = arith.constant 1.000000e+00 : f32
    %61 = vector.broadcast %cst_36 : f32 to vector<8x128xf32>
    %62 = arith.addf %61, %60 : vector<8x128xf32>
    %63 = tpu.reciprocal %62 {approx = true} : vector<8x128xf32> -> vector<8x128xf32>
    %64 = arith.mulf %63, %22 : vector<8x128xf32>
    %cst_37 = arith.constant 1.000000e+00 : f32
    %65 = vector.broadcast %cst_37 : f32 to vector<8x128xf32>
    %66 = arith.subf %65, %63 : vector<8x128xf32>
    %67 = arith.mulf %66, %56 : vector<8x128xf32>
    %68 = arith.addf %64, %67 : vector<8x128xf32>
    %69 = arith.truncf %68 : vector<8x128xf32> to vector<8x128xbf16>
    %c1_38 = arith.constant 1 : index
    %c0_39 = arith.constant 0 : index
    %c0_40 = arith.constant 0 : index
    %70 = vector.load %arg5[%c1_38, %c0_39, %c0_40] : memref<2x128x256xbf16, #tpu.memory_space<vmem>>, vector<1x128x256xbf16>
    %71 = vector.shape_cast %70 : vector<1x128x256xbf16> to vector<128x256xbf16>
    %cst_41 = arith.constant dense<0.000000e+00> : vector<8x256xf32>
    %72 = tpu.matmul %69, %71, %cst_41 {dimension_numbers = #tpu.dot_dimension_numbers<[1], [0], [0], [1], [0, 0, 1, 1], [], []>} : vector<8x128xbf16>, vector<128x256xbf16>, vector<8x256xf32> -> vector<8x256xf32>
    %c1_42 = arith.constant 1 : index
    %c0_43 = arith.constant 0 : index
    %c0_44 = arith.constant 0 : index
    %73 = vector.load %arg6[%c1_42, %c0_43, %c0_44] : memref<2x1x256xf32, #tpu.memory_space<vmem>>, vector<1x1x256xf32>
    %74 = vector.shape_cast %73 : vector<1x1x256xf32> to vector<1x256xf32>
    %75 = vector.broadcast %74 : vector<1x256xf32> to vector<8x256xf32>
    %76 = arith.addf %72, %75 : vector<8x256xf32>
    %77 = vector.extract_strided_slice %76 {offsets = [0, 0], sizes = [8, 128], strides = [1, 1]} : vector<8x256xf32> to vector<8x128xf32>
    %cst_45 = arith.constant 0.000000e+00 : f32
    %78 = vector.broadcast %cst_45 : f32 to vector<8x128xf32>
    %79 = arith.maximumf %77, %78 : vector<8x128xf32>
    %80 = vector.extract_strided_slice %76 {offsets = [0, 128], sizes = [8, 128], strides = [1, 1]} : vector<8x256xf32> to vector<8x128xf32>
    %cst_46 = arith.constant 0.000000e+00 : f32
    %81 = vector.broadcast %cst_46 : f32 to vector<8x128xf32>
    %82 = arith.subf %81, %80 : vector<8x128xf32>
    %83 = math.exp %82 : vector<8x128xf32>
    %cst_47 = arith.constant 1.000000e+00 : f32
    %84 = vector.broadcast %cst_47 : f32 to vector<8x128xf32>
    %85 = arith.addf %84, %83 : vector<8x128xf32>
    %86 = tpu.reciprocal %85 {approx = true} : vector<8x128xf32> -> vector<8x128xf32>
    %87 = arith.mulf %86, %68 : vector<8x128xf32>
    %cst_48 = arith.constant 1.000000e+00 : f32
    %88 = vector.broadcast %cst_48 : f32 to vector<8x128xf32>
    %89 = arith.subf %88, %86 : vector<8x128xf32>
    %90 = arith.mulf %89, %79 : vector<8x128xf32>
    %91 = arith.addf %87, %90 : vector<8x128xf32>
    %92 = arith.truncf %45 : vector<8x128xf32> to vector<8x128xbf16>
    %c0_49 = arith.constant 0 : index
    %c0_50 = arith.constant 0 : index
    %c0_51 = arith.constant 0 : index
    %93 = vector.load %arg7[%c0_49, %c0_50, %c0_51] : memref<2x128x256xbf16, #tpu.memory_space<vmem>>, vector<1x128x256xbf16>
    %94 = vector.shape_cast %93 : vector<1x128x256xbf16> to vector<128x256xbf16>
    %cst_52 = arith.constant dense<0.000000e+00> : vector<8x256xf32>
    %95 = tpu.matmul %92, %94, %cst_52 {dimension_numbers = #tpu.dot_dimension_numbers<[1], [0], [0], [1], [0, 0, 1, 1], [], []>} : vector<8x128xbf16>, vector<128x256xbf16>, vector<8x256xf32> -> vector<8x256xf32>
    %c0_53 = arith.constant 0 : index
    %c0_54 = arith.constant 0 : index
    %c0_55 = arith.constant 0 : index
    %96 = vector.load %arg8[%c0_53, %c0_54, %c0_55] : memref<2x1x256xf32, #tpu.memory_space<vmem>>, vector<1x1x256xf32>
    %97 = vector.shape_cast %96 : vector<1x1x256xf32> to vector<1x256xf32>
    %98 = vector.broadcast %97 : vector<1x256xf32> to vector<8x256xf32>
    %99 = arith.addf %95, %98 : vector<8x256xf32>
    %100 = vector.extract_strided_slice %99 {offsets = [0, 0], sizes = [8, 128], strides = [1, 1]} : vector<8x256xf32> to vector<8x128xf32>
    %cst_56 = arith.constant 0.000000e+00 : f32
    %101 = vector.broadcast %cst_56 : f32 to vector<8x128xf32>
    %102 = arith.maximumf %100, %101 : vector<8x128xf32>
    %103 = vector.extract_strided_slice %99 {offsets = [0, 128], sizes = [8, 128], strides = [1, 1]} : vector<8x256xf32> to vector<8x128xf32>
    %cst_57 = arith.constant 0.000000e+00 : f32
    %104 = vector.broadcast %cst_57 : f32 to vector<8x128xf32>
    %105 = arith.subf %104, %103 : vector<8x128xf32>
    %106 = math.exp %105 : vector<8x128xf32>
    %cst_58 = arith.constant 1.000000e+00 : f32
    %107 = vector.broadcast %cst_58 : f32 to vector<8x128xf32>
    %108 = arith.addf %107, %106 : vector<8x128xf32>
    %109 = tpu.reciprocal %108 {approx = true} : vector<8x128xf32> -> vector<8x128xf32>
    %110 = arith.mulf %109, %45 : vector<8x128xf32>
    %cst_59 = arith.constant 1.000000e+00 : f32
    %111 = vector.broadcast %cst_59 : f32 to vector<8x128xf32>
    %112 = arith.subf %111, %109 : vector<8x128xf32>
    %113 = arith.mulf %112, %102 : vector<8x128xf32>
    %114 = arith.addf %110, %113 : vector<8x128xf32>
    %115 = arith.truncf %114 : vector<8x128xf32> to vector<8x128xbf16>
    %c1_60 = arith.constant 1 : index
    %c0_61 = arith.constant 0 : index
    %c0_62 = arith.constant 0 : index
    %116 = vector.load %arg7[%c1_60, %c0_61, %c0_62] : memref<2x128x256xbf16, #tpu.memory_space<vmem>>, vector<1x128x256xbf16>
    %117 = vector.shape_cast %116 : vector<1x128x256xbf16> to vector<128x256xbf16>
    %cst_63 = arith.constant dense<0.000000e+00> : vector<8x256xf32>
    %118 = tpu.matmul %115, %117, %cst_63 {dimension_numbers = #tpu.dot_dimension_numbers<[1], [0], [0], [1], [0, 0, 1, 1], [], []>} : vector<8x128xbf16>, vector<128x256xbf16>, vector<8x256xf32> -> vector<8x256xf32>
    %c1_64 = arith.constant 1 : index
    %c0_65 = arith.constant 0 : index
    %c0_66 = arith.constant 0 : index
    %119 = vector.load %arg8[%c1_64, %c0_65, %c0_66] : memref<2x1x256xf32, #tpu.memory_space<vmem>>, vector<1x1x256xf32>
    %120 = vector.shape_cast %119 : vector<1x1x256xf32> to vector<1x256xf32>
    %121 = vector.broadcast %120 : vector<1x256xf32> to vector<8x256xf32>
    %122 = arith.addf %118, %121 : vector<8x256xf32>
    %123 = vector.extract_strided_slice %122 {offsets = [0, 0], sizes = [8, 128], strides = [1, 1]} : vector<8x256xf32> to vector<8x128xf32>
    %cst_67 = arith.constant 0.000000e+00 : f32
    %124 = vector.broadcast %cst_67 : f32 to vector<8x128xf32>
    %125 = arith.maximumf %123, %124 : vector<8x128xf32>
    %126 = vector.extract_strided_slice %122 {offsets = [0, 128], sizes = [8, 128], strides = [1, 1]} : vector<8x256xf32> to vector<8x128xf32>
    %cst_68 = arith.constant 0.000000e+00 : f32
    %127 = vector.broadcast %cst_68 : f32 to vector<8x128xf32>
    %128 = arith.subf %127, %126 : vector<8x128xf32>
    %129 = math.exp %128 : vector<8x128xf32>
    %cst_69 = arith.constant 1.000000e+00 : f32
    %130 = vector.broadcast %cst_69 : f32 to vector<8x128xf32>
    %131 = arith.addf %130, %129 : vector<8x128xf32>
    %132 = tpu.reciprocal %131 {approx = true} : vector<8x128xf32> -> vector<8x128xf32>
    %133 = arith.mulf %132, %114 : vector<8x128xf32>
    %cst_70 = arith.constant 1.000000e+00 : f32
    %134 = vector.broadcast %cst_70 : f32 to vector<8x128xf32>
    %135 = arith.subf %134, %132 : vector<8x128xf32>
    %136 = arith.mulf %135, %125 : vector<8x128xf32>
    %137 = arith.addf %133, %136 : vector<8x128xf32>
    %138 = arith.addf %91, %1 : vector<8x128xf32>
    %139 = arith.addf %137, %24 : vector<8x128xf32>
    %c0_71 = arith.constant 0 : index
    %c0_72 = arith.constant 0 : index
    %c0_73 = arith.constant 0 : index
    %140 = vector.load %arg9[%c0_71, %c0_72, %c0_73] : memref<1x8x128xf32, #tpu.memory_space<vmem>>, vector<1x8x128xf32>
    %141 = vector.shape_cast %140 : vector<1x8x128xf32> to vector<8x128xf32>
    %142 = vector.shape_cast %138 : vector<8x128xf32> to vector<1x8x128xf32>
    tpu.vector_store %arg9[%c0_71, %c0_72, %c0_73], %142 {strides = array<i32>} : memref<1x8x128xf32, #tpu.memory_space<vmem>>, vector<1x8x128xf32>,
    %c0_74 = arith.constant 0 : index
    %c0_75 = arith.constant 0 : index
    %c0_76 = arith.constant 0 : index
    %143 = vector.load %arg10[%c0_74, %c0_75, %c0_76] : memref<1x8x128xf32, #tpu.memory_space<vmem>>, vector<1x8x128xf32>
    %144 = vector.shape_cast %143 : vector<1x8x128xf32> to vector<8x128xf32>
    %145 = vector.shape_cast %139 : vector<8x128xf32> to vector<1x8x128xf32>
    tpu.vector_store %arg10[%c0_74, %c0_75, %c0_76], %145 {strides = array<i32>} : memref<1x8x128xf32, #tpu.memory_space<vmem>>, vector<1x8x128xf32>,
    return
  }
  func.func @transform_0(%arg0: i32) -> i32 {
    %c0_i32 = arith.constant 0 : i32
    %c0_i32_0 = arith.constant 0 : i32
    return %c0_i32 : i32
  }
  func.func @transform_1(%arg0: i32) -> i32 {
    %c0_i32 = arith.constant 0 : i32
    %c0_i32_0 = arith.constant 0 : i32
    return %c0_i32 : i32
  }
  func.func @transform_2(%arg0: i32) -> (i32, i32, i32) {
    %c0_i32 = arith.constant 0 : i32
    %c0_i32_0 = arith.constant 0 : i32
    %c0_i32_1 = arith.constant 0 : i32
    return %arg0, %c0_i32, %c0_i32_0 : i32, i32, i32
  }
  func.func @transform_3(%arg0: i32) -> (i32, i32, i32) {
    %c0_i32 = arith.constant 0 : i32
    %c0_i32_0 = arith.constant 0 : i32
    %c0_i32_1 = arith.constant 0 : i32
    return %arg0, %c0_i32, %c0_i32_0 : i32, i32, i32
  }
  func.func @transform_4(%arg0: i32) -> (i32, i32, i32) {
    %c0_i32 = arith.constant 0 : i32
    %c0_i32_0 = arith.constant 0 : i32
    %c0_i32_1 = arith.constant 0 : i32
    %c0_i32_2 = arith.constant 0 : i32
    return %c0_i32, %c0_i32_0, %c0_i32_1 : i32, i32, i32
  }
  func.func @transform_5(%arg0: i32) -> (i32, i32, i32) {
    %c0_i32 = arith.constant 0 : i32
    %c0_i32_0 = arith.constant 0 : i32
    %c0_i32_1 = arith.constant 0 : i32
    %c0_i32_2 = arith.constant 0 : i32
    return %c0_i32, %c0_i32_0, %c0_i32_1 : i32, i32, i32
  }
  func.func @transform_6(%arg0: i32) -> (i32, i32, i32) {
    %c0_i32 = arith.constant 0 : i32
    %c0_i32_0 = arith.constant 0 : i32
    %c0_i32_1 = arith.constant 0 : i32
    %c0_i32_2 = arith.constant 0 : i32
    return %c0_i32, %c0_i32_0, %c0_i32_1 : i32, i32, i32
  }
  func.func @transform_7(%arg0: i32) -> (i32, i32, i32) {
    %c0_i32 = arith.constant 0 : i32
    %c0_i32_0 = arith.constant 0 : i32
    %c0_i32_1 = arith.constant 0 : i32
    %c0_i32_2 = arith.constant 0 : i32
    return %c0_i32, %c0_i32_0, %c0_i32_1 : i32, i32, i32
  }
  func.func @transform_8(%arg0: i32) -> (i32, i32, i32) {
    %c0_i32 = arith.constant 0 : i32
    %c0_i32_0 = arith.constant 0 : i32
    %c0_i32_1 = arith.constant 0 : i32
    return %arg0, %c0_i32, %c0_i32_0 : i32, i32, i32
  }
  func.func @transform_9(%arg0: i32) -> (i32, i32, i32) {
    %c0_i32 = arith.constant 0 : i32
    %c0_i32_0 = arith.constant 0 : i32
    %c0_i32_1 = arith.constant 0 : i32
    return %arg0, %c0_i32, %c0_i32_0 : i32, i32, i32
  }
}

</mosaic_0001>

<bundles_post_ra>
// kernel: lbl_highway_bilm_forward.2
= control target key start
LH: loop header
LB: loop body
LE: loop exit
PB: predicated region body
PF: predicated region fallthrough
CT: control target
= control target key end

     0   :  { %15 = vsyncpa [#allocation3], 0  ;;  %s2109_s0 = inlined_call_operand.vmem [shape: f32[4], index: 0, kind: input, shape index: {}]   ;;  %s2110_s1 = inlined_call_operand.vmem [shape: f32[4], index: 1, kind: input, shape index: {}]   ;;  %s2111_s2 = inlined_call_operand.vmem [shape: f32[2,11,128], index: 2, kind: input, shape index: {}]   ;;  %s2112_s3 = inlined_call_operand.vmem [shape: f32[2,11,128], index: 3, kind: input, shape index: {}]   ;;  %s2113_s4 = inlined_call_operand.vmem [shape: bf16[2,128,256], index: 4, kind: input, shape index: {}]   ;;  %s2114_s5 = inlined_call_operand.vmem [shape: f32[2,1,256], index: 5, kind: input, shape index: {}]   ;;  %s2115_s6 = inlined_call_operand.vmem [shape: bf16[2,128,256], index: 6, kind: input, shape index: {}]   ;;  %s2116_s7 = inlined_call_operand.vmem [shape: f32[2,1,256], index: 7, kind: input, shape index: {}]   ;;  %s2117_s8 = inlined_call_operand.vmem [shape: f32[2,8,128], index: 8, kind: output, shape index: {0}]   ;;  %s2118_s9 = inlined_call_operand.vmem [shape: f32[2,8,128], index: 9, kind: output, shape index: {1}]  }
   0x1   :  { %16 = vsyncpa [#allocation5], 0  ;;  %s1629_s30 = smov 0  }
   0x2 LB: > { %s1635_s10 = sadd.s32 4294967295, %s1575_s30   ;;  %p1109_p0 = scmp.ge.s32.totalorder %s1575_s30, 1  ;;  %s1575_s30 = sphi %s1629_s30, %s22_s30  }
   0x3   : > { %p257_p1 = scmp.lt.s32.totalorder %s1575_s30, 3  ;;  %s269_s13 = sshll.u32 %s2109_s0, 4  ;;  %s270_s13 = int_to_ptr.vmem [resolvable:$true] %s269_s13 }
   0x4   : > { %p1501_p3 = scmp.eq.s32.totalorder %s1635_s10, 0  ;;  %s279_s16 = sshll.u32 %s2110_s1, 4  ;;  %s280_s16 = int_to_ptr.vmem [resolvable:$true] %s279_s16 }
   0x5   : > { %p258_p2 = pnand %p1109_p0, %p257_p1  ;;  %s1577_s17 = smov [#allocation2]  }
   0x6   : > { %s1578_s18 = smov [#allocation4]  }
   0x7   : > { %p1494_p4 = pneg %p258_p2 }
   0x8   : > { %320 = sbr.rel (%p258_p2) target bundleno = 401 (0x191), region = 52 }
   0x9   : > { %p1495_p5 = pnand %p1501_p3, %p1494_p4 }
   0xb   : > { %1497 = dma.vmem_to_smem (!%p1495_p5), %s270_s13, 16, %s1577_s17, [#allocation3]  }
   0xc   : > { %1500 = dma.vmem_to_smem (!%p1495_p5), %s280_s16, 16, %s1578_s18, [#allocation5]  }
   0xd   : > { %1566 = dma.done.wait (%p1501_p3), [#allocation3], 16  }
   0xe   : > { %1568 = vsyncadd (%p1501_p3), [#allocation3], 4294967280 }
   0xf   : > { %1570 = dma.done.wait (%p1501_p3), [#allocation5], 16  }
  0x10   : > { %1572 = vsyncadd (%p1501_p3), [#allocation5], 4294967280 }
  0x11   : > { %332 = sfence }
  0x12   : > { %v1436_v0 = vld [vmem:[%s2113_s4 + $0x74] sm:$0xf]  ;;  %v1188_v1 = vld [vmem:[%s2113_s4 + $0x78] sm:$0xf0]  ;;  %v1434_v2 = vld [vmem:[%s2113_s4 + $0x64] sm:$0xf] }
  0x13   : > { %v1191_v3 = vor.u32 %v1436_v0, %v1188_v1  ;;  %v1180_v4 = vld [vmem:[%s2113_s4 + $0x68] sm:$0xf0]  ;;  %v1186_v5 = vld [vmem:[%s2113_s4 + $0x70] sm:$0xf]  ;;  %v1437_v6 = vld [vmem:[%s2113_s4 + $0x74] sm:$0xf0] }
  0x14   : > { %v1183_v7 = vor.u32 %v1434_v2, %v1180_v4  ;;  %v1187_v8 = vor.u32 %v1437_v6, %v1186_v5  ;;  %v1178_v9 = vld [vmem:[%s2113_s4 + $0x60] sm:$0xf]  ;;  %v1435_v10 = vld [vmem:[%s2113_s4 + $0x64] sm:$0xf0]  ;;  %v1432_v11 = vld [vmem:[%s2113_s4 + $0x54] sm:$0xf] }
  0x15   : > { %543 = vmatpush.bf16.msra.mxu1 %v1191_v3  ;;  %v1172_v12 = vld [vmem:[%s2113_s4 + $0x58] sm:$0xf0]  ;;  %v1179_v13 = vor.u32 %v1435_v10, %v1178_v9  ;;  %v1170_v14 = vld [vmem:[%s2113_s4 + $0x50] sm:$0xf]  ;;  %v1433_v15 = vld [vmem:[%s2113_s4 + $0x54] sm:$0xf0] }
  0x16   : > { %530 = vmatpush.bf16.msra.mxu0 %v1187_v8  ;;  %v1175_v16 = vor.u32 %v1432_v11, %v1172_v12  ;;  %v1430_v17 = vld [vmem:[%s2113_s4 + $0x44] sm:$0xf]  ;;  %v1164_v18 = vld [vmem:[%s2113_s4 + $0x48] sm:$0xf0]  ;;  %v1171_v19 = vor.u32 %v1433_v15, %v1170_v14  ;;  %p371_p6 = scmp.lt.s32.totalorder %s1635_s10, 1  ;;  %s1122_s28 = sld [smem:[#allocation2 + $0x3]] }
  0x17   : > { %v1162_v20 = vld [vmem:[%s2113_s4 + $0x40] sm:$0xf]  ;;  %v1431_v21 = vld [vmem:[%s2113_s4 + $0x44] sm:$0xf0]  ;;  %s393_s14 = sld [smem:[#allocation2]]  ;;  %v1167_v22 = vor.u32 %v1430_v17, %v1164_v18 }
  0x18   : > { %s2120_s10 = smov (!%p371_p6, %s1635_s10), 1  ;;  %v1428_v23 = vld [vmem:[%s2113_s4 + $0x34] sm:$0xf]  ;;  %v1156_v24 = vld [vmem:[%s2113_s4 + $0x38] sm:$0xf0]  ;;  %s1123_s19 = sld [smem:[#allocation2 + $0x1]]  ;;  %v1163_v25 = vor.u32 %v1431_v21, %v1162_v20 }
  0x19   : > { %544 = vmatpush.bf16.msra.mxu1 %v1183_v7  ;;  %s1420_s20 = sshll.u32 %s2120_s10, 4  ;;  %s1715_s21 = sld [smem:[#allocation2 + $0x2]]  ;;  %v1154_v26 = vld [vmem:[%s2113_s4 + $0x30] sm:$0xf]  ;;  %v1429_v27 = vld [vmem:[%s2113_s4 + $0x34] sm:$0xf0]  ;;  %v1159_v28 = vor.u32 %v1428_v23, %v1156_v24 }
  0x1a   : > { %531 = vmatpush.bf16.msra.mxu0 %v1179_v13  ;;  %s375_s29 = scalar_lea.vmem %s2111_s2, %s1420_s20  ;;  %v1426_v32 = vld [vmem:[%s2113_s4 + $0x24] sm:$0xf]  ;;  %v1148_v33 = vld [vmem:[%s2113_s4 + $0x28] sm:$0xf0]  ;;  %v1155_v37 = vor.u32 %v1429_v27, %v1154_v26  ;;  %v1146_v40 = vld [vmem:[%s2113_s4 + $0x20] sm:$0xf] }
  0x1b   : > { %v389_v29 = vld [vmem:[%s375_s29 + $0x3] sm:$0xff]  ;;  %v1151_v42 = vor.u32 %v1426_v32, %v1148_v33  ;;  %v1424_v47 = vld [vmem:[%s2113_s4 + $0x14] sm:$0xf]  ;;  %v1140_v48 = vld [vmem:[%s2113_s4 + $0x18] sm:$0xf0]  ;;  %s1793_s16 = sld [smem:[#allocation4]] }
  0x1c   : > { %v391_v30 = vstv %s1122_s28  ;;  %v394_v31 = vld [vmem:[%s375_s29] sm:$0xff]  ;;  %v1427_v41 = vld [vmem:[%s2113_s4 + $0x24] sm:$0xf0]  ;;  %v1138_v52 = vld [vmem:[%s2113_s4 + $0x10] sm:$0xf]  ;;  %v1143_v54 = vor.u32 %v1424_v47, %v1140_v48  ;;  %s1795_s17 = sld [smem:[#allocation4 + $0x1]] }
  0x1d   : > { %545 = vmatpush.bf16.msra.mxu1 %v1175_v16  ;;  %v392_v34 = vmul.f32 %v391_v30, %v389_v29  ;;  %v395_v35 = vstv %s393_s14  ;;  %v399_v36 = vld [vmem:[%s375_s29 + $0x1] sm:$0xff]  ;;  %v1147_v49 = vor.u32 %v1427_v41, %v1146_v40  ;;  %v1425_v53 = vld [vmem:[%s2113_s4 + $0x14] sm:$0xf0]  ;;  %v1132_v56 = vld [vmem:[%s2113_s4 + $0x8] sm:$0xf0]  ;;  %s1809_s26 = sld [smem:[#allocation4 + $0x2]] }
  0x1e   : > { %532 = vmatpush.bf16.msra.mxu0 %v1171_v19  ;;  %v396_v38 = vmul.f32 %v395_v35, %v394_v31  ;;  %v400_v39 = vstv %s1123_s19  ;;  %v404_v45 = vld [vmem:[%s375_s29 + $0x2] sm:$0xff]  ;;  %v1468_v57 = vld [vmem:[%s2115_s6 + $0x74] sm:$0xf]  ;;  %v1333_v58 = vld [vmem:[%s2115_s6 + $0x78] sm:$0xf0]  ;;  %v1139_v59 = vor.u32 %v1425_v53, %v1138_v52  ;;  %s1816_s29 = scalar_lea.vmem %s2112_s3, %s1420_s20  ;;  %s1127_s20 = sld [smem:[#allocation4 + $0x3]] }
  0x1f   : > { %v401_v44 = vmul.f32 %v400_v39, %v399_v36  ;;  %v405_v46 = vstv %s1715_s21  ;;  %v1422_v55 = vld [vmem:[%s2113_s4 + $0x4] sm:$0xf]  ;;  %v1130_v61 = vld [vmem:[%s2113_s4] sm:$0xf]  ;;  %v1423_v62 = vld [vmem:[%s2113_s4 + $0x4] sm:$0xf0]  ;;  %v1336_v2 = vor.u32 %v1468_v57, %v1333_v58 }
  0x20   : > { %v397_v43 = vadd.f32 %v396_v38, %v392_v34  ;;  %v406_v51 = vmul.f32 %v405_v46, %v404_v45  ;;  %v1135_v63 = vor.u32 %v1422_v55, %v1132_v56  ;;  %v1331_v0 = vld [vmem:[%s2115_s6 + $0x70] sm:$0xf]  ;;  %v1469_v1 = vld [vmem:[%s2115_s6 + $0x74] sm:$0xf0]  ;;  %v1466_v3 = vld [vmem:[%s2115_s6 + $0x64] sm:$0xf]  ;;  %v1131_v5 = vor.u32 %v1423_v62, %v1130_v61 }
  0x21   : > { %546 = vmatpush.bf16.msra.mxu1 %v1167_v22  ;;  %v1325_v4 = vld [vmem:[%s2115_s6 + $0x68] sm:$0xf0]  ;;  %v1332_v7 = vor.u32 %v1469_v1, %v1331_v0  ;;  %v1323_v8 = vld [vmem:[%s2115_s6 + $0x60] sm:$0xf]  ;;  %v1467_v9 = vld [vmem:[%s2115_s6 + $0x64] sm:$0xf0]  ;;  %v410_v24 = vstv %s1793_s16 }
  0x22   : > { %533 = vmatpush.bf16.msra.mxu0 %v1163_v25  ;;  %v402_v50 = vadd.f32 %v401_v44, %v397_v43  ;;  %v1328_v10 = vor.u32 %v1466_v3, %v1325_v4  ;;  %v1464_v11 = vld [vmem:[%s2115_s6 + $0x54] sm:$0xf]  ;;  %v1317_v12 = vld [vmem:[%s2115_s6 + $0x58] sm:$0xf0]  ;;  %v1324_v13 = vor.u32 %v1467_v9, %v1323_v8  ;;  %v1315_v14 = vld [vmem:[%s2115_s6 + $0x50] sm:$0xf]  ;;  %v414_v26 = vstv %s1795_s17 }
  0x23   : > { %v1465_v15 = vld [vmem:[%s2115_s6 + $0x54] sm:$0xf0]  ;;  %v1320_v16 = vor.u32 %v1464_v11, %v1317_v12  ;;  %v1462_v17 = vld [vmem:[%s2115_s6 + $0x44] sm:$0xf]  ;;  %v1309_v18 = vld [vmem:[%s2115_s6 + $0x48] sm:$0xf0]  ;;  %v419_v36 = vstv %s1809_s26 }
  0x24   : > { %v1765_v60 = vadd.f32 %v406_v51, %v402_v50  ;;  %v1316_v19 = vor.u32 %v1465_v15, %v1315_v14  ;;  %v1307_v20 = vld [vmem:[%s2115_s6 + $0x40] sm:$0xf]  ;;  %v1463_v21 = vld [vmem:[%s2115_s6 + $0x44] sm:$0xf0]  ;;  %v1312_v22 = vor.u32 %v1462_v17, %v1309_v18  ;;  %v1460_v27 = vld [vmem:[%s2115_s6 + $0x34] sm:$0xf]  ;;  %v424_v46 = vstv %s1127_s20 }
  0x25   : > { %547 = vmatpush.bf16.msra.mxu1 %v1159_v28  ;;  %v408_v23 = vld [vmem:[%s1816_s29] sm:$0xff]  ;;  %v1301_v28 = vld [vmem:[%s2115_s6 + $0x38] sm:$0xf0]  ;;  %v1308_v29 = vor.u32 %v1463_v21, %v1307_v20  ;;  %v1299_v30 = vld [vmem:[%s2115_s6 + $0x30] sm:$0xf]  ;;  %s1120_s14 = sshll.u32 %s2120_s10, 3 }
  0x26   : > { %534 = vmatpush.bf16.msra.mxu0 %v1155_v37  ;;  %v427_v6 = vpack.c.bf16 %v1765_v60, %v1765_v60  ;;  %v413_v25 = vld [vmem:[%s1816_s29 + $0x1] sm:$0xff]  ;;  %v1461_v31 = vld [vmem:[%s2115_s6 + $0x34] sm:$0xf0]  ;;  %v411_v32 = vmul.f32 %v410_v24, %v408_v23  ;;  %v1304_v34 = vor.u32 %v1460_v27, %v1301_v28  ;;  %v1293_v38 = vld [vmem:[%s2115_s6 + $0x28] sm:$0xf0]  ;;  %s384_s24 = scalar_lea.vmem %s2117_s8, %s1120_s14  ;;  %s388_s27 = scalar_lea.vmem %s2118_s9, %s1120_s14 }
  0x27   : > { %v415_v33 = vmul.f32 %v414_v26, %v413_v25  ;;  %v418_v35 = vld [vmem:[%s1816_s29 + $0x2] sm:$0xff]  ;;  %v1300_v39 = vor.u32 %v1461_v31, %v1299_v30  ;;  %v1456_v47 = vld [vmem:[%s2115_s6 + $0x14] sm:$0xf]  ;;  %v1285_v48 = vld [vmem:[%s2115_s6 + $0x18] sm:$0xf0] }
  0x28   : > { %v1458_v37 = vld [vmem:[%s2115_s6 + $0x24] sm:$0xf]  ;;  %v420_v41 = vmul.f32 %v419_v36, %v418_v35  ;;  %v1459_v43 = vld [vmem:[%s2115_s6 + $0x24] sm:$0xf0]  ;;  %v1283_v52 = vld [vmem:[%s2115_s6 + $0x10] sm:$0xf] }
  0x29   : > { %548 = vmatpush.bf16.msra.mxu1 %v1151_v42  ;;  %v416_v40 = vadd.f32 %v415_v33, %v411_v32  ;;  %v1291_v42 = vld [vmem:[%s2115_s6 + $0x20] sm:$0xf]  ;;  %v1296_v44 = vor.u32 %v1458_v37, %v1293_v38  ;;  %v1457_v53 = vld [vmem:[%s2115_s6 + $0x14] sm:$0xf0]  ;;  %v1454_v55 = vld [vmem:[%s2115_s6 + $0x4] sm:$0xf] }
  0x2a   : > { %535 = vmatpush.bf16.msra.mxu0 %v1147_v49  ;;  %v423_v45 = vld [vmem:[%s1816_s29 + $0x3] sm:$0xff]  ;;  %v1292_v49 = vor.u32 %v1459_v43, %v1291_v42  ;;  %v1277_v56 = vld [vmem:[%s2115_s6 + $0x8] sm:$0xf0]  ;;  %v1284_v57 = vor.u32 %v1457_v53, %v1283_v52  ;;  %v1267_v1 = vld [vmem:[%s2113_s4 + $0xf0] sm:$0xf] }
  0x2b   : > { %v421_v50 = vadd.f32 %v420_v41, %v416_v40  ;;  %v425_v51 = vmul.f32 %v424_v46, %v423_v45  ;;  %v1455_v61 = vld [vmem:[%s2115_s6 + $0x4] sm:$0xf0]  ;;  %v1280_v62 = vor.u32 %v1454_v55, %v1277_v56  ;;  %v1452_v3 = vld [vmem:[%s2113_s4 + $0xf4] sm:$0xf]  ;;  %v1450_v9 = vld [vmem:[%s2113_s4 + $0xe4] sm:$0xf] }
  0x2c   : > { %v1451_v8 = vld [vmem:[%s2113_s4 + $0xe4] sm:$0xf0]  ;;  %v1261_v11 = vld [vmem:[%s2113_s4 + $0xe8] sm:$0xf0]  ;;  %v1449_v14 = vld [vmem:[%s2113_s4 + $0xd4] sm:$0xf0] }
  0x2d   : > { %549 = vmatpush.bf16.msra.mxu1 %v1143_v54  ;;  %v1288_v54 = vor.u32 %v1456_v47, %v1285_v48  ;;  %v1879_v58 = vadd.f32 %v425_v51, %v421_v50  ;;  %v1264_v12 = vor.u32 %v1450_v9, %v1261_v11  ;;  %v1448_v15 = vld [vmem:[%s2113_s4 + $0xd4] sm:$0xf]  ;;  %v1253_v17 = vld [vmem:[%s2113_s4 + $0xd8] sm:$0xf0]  ;;  %v1447_v20 = vld [vmem:[%s2113_s4 + $0xc4] sm:$0xf0] }
  0x2e   : > { %536 = vmatpush.bf16.msra.mxu0 %v1139_v59  ;;  %v1275_v59 = vld [vmem:[%s2115_s6] sm:$0xf]  ;;  %v1256_v18 = vor.u32 %v1448_v15, %v1253_v17  ;;  %v1446_v21 = vld [vmem:[%s2113_s4 + $0xc4] sm:$0xf]  ;;  %v1245_v23 = vld [vmem:[%s2113_s4 + $0xc8] sm:$0xf0] }
  0x2f   : > { %v707_v0 = vpack.c.bf16 %v1879_v58, %v1879_v58  ;;  %v1248_v24 = vor.u32 %v1446_v21, %v1245_v23  ;;  %v1235_v25 = vld [vmem:[%s2113_s4 + $0xb0] sm:$0xf]  ;;  %v1445_v26 = vld [vmem:[%s2113_s4 + $0xb4] sm:$0xf0]  ;;  %v1444_v27 = vld [vmem:[%s2113_s4 + $0xb4] sm:$0xf] }
  0x30   : > { %v1236_v28 = vor.u32 %v1445_v26, %v1235_v25  ;;  %v1227_v31 = vld [vmem:[%s2113_s4 + $0xa0] sm:$0xf]  ;;  %v1443_v32 = vld [vmem:[%s2113_s4 + $0xa4] sm:$0xf0]  ;;  %v1442_v33 = vld [vmem:[%s2113_s4 + $0xa4] sm:$0xf] }
  0x31   : > { %550 = vmatpush.bf16.msra.mxu1 %v1135_v63  ;;  %v1276_v63 = vor.u32 %v1455_v61, %v1275_v59  ;;  %v1229_v35 = vld [vmem:[%s2113_s4 + $0xa8] sm:$0xf0]  ;;  %v1219_v37 = vld [vmem:[%s2113_s4 + $0x90] sm:$0xf]  ;;  %v1441_v38 = vld [vmem:[%s2113_s4 + $0x94] sm:$0xf0] }
  0x32   : > { %537 = vmatpush.bf16.msra.mxu0 %v1131_v5  ;;  %v1269_v5 = vld [vmem:[%s2113_s4 + $0xf8] sm:$0xf0]  ;;  %v1232_v36 = vor.u32 %v1442_v33, %v1229_v35  ;;  %v1220_v40 = vor.u32 %v1441_v38, %v1219_v37  ;;  %v1211_v43 = vld [vmem:[%s2113_s4 + $0x80] sm:$0xf]  ;;  %v1438_v45 = vld [vmem:[%s2113_s4 + $0x84] sm:$0xf] }
  0x33   : > { %v1221_v41 = vld [vmem:[%s2113_s4 + $0x98] sm:$0xf0]  ;;  %v1985_v46 = vld [vmem:[%s2114_s5] sm:$0x3]  ;;  %v1213_v48 = vld [vmem:[%s2113_s4 + $0x88] sm:$0xf0] }
  0x34   : > { %551 = vmatmul.bf16.vlgmr.msra.gmra.mxu1 %v427_v6  ;;  %v1216_v50 = vor.u32 %v1438_v45, %v1213_v48  ;;  %v1485_v51 = vld [vmem:[%s2115_s6 + $0xf4] sm:$0xf0]  ;;  %v1484_v52 = vld [vmem:[%s2115_s6 + $0xf4] sm:$0xf]  ;;  %v447_v55 = vperm.slane %v1985_v46, 1 }
  0x35   : > { %823 = vmatpush.bf16.msrb.mxu1 %v1336_v2  ;;  %538 = vmatmul.bf16.vlgmr.msra.gmra.mxu0 %v427_v6  ;;  %v1453_v2 = vld [vmem:[%s2113_s4 + $0xf4] sm:$0xf0]  ;;  %v1272_v6 = vor.u32 %v1452_v3, %v1269_v5  ;;  %v1483_v59 = vld [vmem:[%s2115_s6 + $0xe4] sm:$0xf0]  ;;  %v1482_v61 = vld [vmem:[%s2115_s6 + $0xe4] sm:$0xf] }
  0x36   : > { %810 = vmatpush.bf16.msrb.mxu0 %v1332_v7  ;;  %v1268_v4 = vor.u32 %v1453_v2, %v1267_v1  ;;  %v1259_v7 = vld [vmem:[%s2113_s4 + $0xe0] sm:$0xf]  ;;  %v1481_v5 = vld [vmem:[%s2115_s6 + $0xd4] sm:$0xf0]  ;;  %v1398_v9 = vld [vmem:[%s2115_s6 + $0xd8] sm:$0xf0] }
  0x37   : > { %684 = vmatpush.bf16.msra.mxu3 %v1272_v6  ;;  %v1480_v6 = vld [vmem:[%s2115_s6 + $0xd4] sm:$0xf]  ;;  %v1477_v21 = vld [vmem:[%s2115_s6 + $0xb4] sm:$0xf0]  ;;  %v1374_v33 = vld [vmem:[%s2115_s6 + $0xa8] sm:$0xf0] }
  0x38   : > { %671 = vmatpush.bf16.msra.mxu2 %v1268_v4  ;;  %v1396_v4 = vld [vmem:[%s2115_s6 + $0xd0] sm:$0xf]  ;;  %v1473_v37 = vld [vmem:[%s2115_s6 + $0x94] sm:$0xf0]  ;;  %v1472_v38 = vld [vmem:[%s2115_s6 + $0x94] sm:$0xf] }
  0x39   : > { %824 = vmatpush.bf16.msrb.mxu1 %v1328_v10  ;;  %v1260_v10 = vor.u32 %v1451_v8, %v1259_v7  ;;  %v1397_v8 = vor.u32 %v1481_v5, %v1396_v4  ;;  %v1471_v45 = vld [vmem:[%s2115_s6 + $0x84] sm:$0xf0]  ;;  %v724_v48 = vld [vmem:[%s2116_s7] sm:$0x3] }
  0x3a   : > { %811 = vmatpush.bf16.msrb.mxu0 %v1324_v13  ;;  %v1251_v13 = vld [vmem:[%s2113_s4 + $0xd0] sm:$0xf] }
  0x3b   : > { %685 = vmatpush.bf16.msra.mxu3 %v1264_v12  ;;  %v1388_v12 = vld [vmem:[%s2115_s6 + $0xc0] sm:$0xf] }
  0x3c   : > { %672 = vmatpush.bf16.msra.mxu2 %v1260_v10  ;;  %v1401_v10 = vor.u32 %v1480_v6, %v1398_v9 }
  0x3d   : > { %825 = vmatpush.bf16.msrb.mxu1 %v1320_v16  ;;  %v1252_v16 = vor.u32 %v1449_v14, %v1251_v13  ;;  %v1479_v13 = vld [vmem:[%s2115_s6 + $0xc4] sm:$0xf0]  ;;  %v1478_v14 = vld [vmem:[%s2115_s6 + $0xc4] sm:$0xf] }
  0x3e   : > { %812 = vmatpush.bf16.msrb.mxu0 %v1316_v19  ;;  %v1243_v19 = vld [vmem:[%s2113_s4 + $0xc0] sm:$0xf]  ;;  %v1389_v15 = vor.u32 %v1479_v13, %v1388_v12 }
  0x3f   : > { %686 = vmatpush.bf16.msra.mxu3 %v1256_v18  ;;  %v1208_v12 = vld [vmem:[%s2114_s5 + $0x2] sm:$0x3] }
  0x40   : > { %673 = vmatpush.bf16.msra.mxu2 %v1252_v16  ;;  %v1390_v16 = vld [vmem:[%s2115_s6 + $0xc8] sm:$0xf0]  ;;  %v588_v13 = vperm.slane %v1208_v12, 1 }
  0x41   : > { %826 = vmatpush.bf16.msrb.mxu1 %v1312_v22  ;;  %v1244_v22 = vor.u32 %v1447_v20, %v1243_v19  ;;  %v1393_v18 = vor.u32 %v1478_v14, %v1390_v16  ;;  %v1380_v20 = vld [vmem:[%s2115_s6 + $0xb0] sm:$0xf] }
  0x42   : > { %813 = vmatpush.bf16.msrb.mxu0 %v1308_v29  ;;  %v1237_v29 = vld [vmem:[%s2113_s4 + $0xb8] sm:$0xf0]  ;;  %v1381_v23 = vor.u32 %v1477_v21, %v1380_v20 }
  0x43   : > { %687 = vmatpush.bf16.msra.mxu3 %v1248_v24  ;;  %v1240_v30 = vor.u32 %v1444_v27, %v1237_v29  ;;  %v1382_v24 = vld [vmem:[%s2115_s6 + $0xb8] sm:$0xf0]  ;;  %v446_v27 = vperm.slane %v1985_v46, 0  ;;  %v1372_v29 = vld [vmem:[%s2115_s6 + $0xa0] sm:$0xf] }
  0x44   : > { %674 = vmatpush.bf16.msra.mxu2 %v1244_v22  ;;  %v1476_v22 = vld [vmem:[%s2115_s6 + $0xb4] sm:$0xf]  ;;  %v1470_v46 = vld [vmem:[%s2115_s6 + $0x84] sm:$0xf] }
  0x45   : > { %827 = vmatpush.bf16.msrb.mxu1 %v1304_v34  ;;  %v1228_v34 = vor.u32 %v1443_v32, %v1227_v31  ;;  %v1385_v25 = vor.u32 %v1476_v22, %v1382_v24  ;;  %v1474_v32 = vld [vmem:[%s2115_s6 + $0xa4] sm:$0xf]  ;;  %v587_v22 = vperm.slane %v1208_v12, 0 }
  0x46   : > { %814 = vmatpush.bf16.msrb.mxu0 %v1300_v39  ;;  %v1440_v39 = vld [vmem:[%s2113_s4 + $0x94] sm:$0xf] }
  0x47   : > { %688 = vmatpush.bf16.msra.mxu3 %v1240_v30  ;;  %v1224_v42 = vor.u32 %v1440_v39, %v1221_v41  ;;  %v1475_v30 = vld [vmem:[%s2115_s6 + $0xa4] sm:$0xf0] }
  0x48   : > { %675 = vmatpush.bf16.msra.mxu2 %v1236_v28  ;;  %v1373_v31 = vor.u32 %v1475_v30, %v1372_v29 }
  0x49   : > { %828 = vmatpush.bf16.msrb.mxu1 %v1296_v44  ;;  %v1439_v44 = vld [vmem:[%s2113_s4 + $0x84] sm:$0xf0] }
  0x4a   : > { %815 = vmatpush.bf16.msrb.mxu0 %v1292_v49  ;;  %v1212_v47 = vor.u32 %v1439_v44, %v1211_v43  ;;  %v1412_v49 = vld [vmem:[%s2115_s6 + $0xf0] sm:$0xf]  ;;  %v1356_v44 = vld [vmem:[%s2115_s6 + $0x80] sm:$0xf] }
  0x4b   : > { %689 = vmatpush.bf16.msra.mxu3 %v1232_v36  ;;  %v1413_v53 = vor.u32 %v1485_v51, %v1412_v49  ;;  %v1364_v36 = vld [vmem:[%s2115_s6 + $0x90] sm:$0xf]  ;;  %v1358_v51 = vld [vmem:[%s2115_s6 + $0x88] sm:$0xf0] }
  0x4c   : > { %676 = vmatpush.bf16.msra.mxu2 %v1228_v34  ;;  %v1377_v34 = vor.u32 %v1474_v32, %v1374_v33  ;;  %v1365_v39 = vor.u32 %v1473_v37, %v1364_v36 }
  0x4d   : > { %829 = vmatpush.bf16.msrb.mxu1 %v1288_v54  ;;  %v1414_v54 = vld [vmem:[%s2115_s6 + $0xf8] sm:$0xf0] }
  0x4e   : > { %816 = vmatpush.bf16.msrb.mxu0 %v1284_v57  ;;  %v1417_v56 = vor.u32 %v1484_v52, %v1414_v54  ;;  %v1404_v57 = vld [vmem:[%s2115_s6 + $0xe0] sm:$0xf]  ;;  %v1361_v52 = vor.u32 %v1470_v46, %v1358_v51  ;;  %v727_v54 = vperm.slane %v724_v48, 1 }
  0x4f   : > { %690 = vmatpush.bf16.msra.mxu3 %v1224_v42 }
  0x50   : > { %677 = vmatpush.bf16.msra.mxu2 %v1220_v40  ;;  %v1366_v40 = vld [vmem:[%s2115_s6 + $0x98] sm:$0xf0] }
  0x51   : > { %830 = vmatpush.bf16.msrb.mxu1 %v1280_v62  ;;  %v1405_v62 = vor.u32 %v1483_v59, %v1404_v57  ;;  %v1369_v41 = vor.u32 %v1472_v38, %v1366_v40 }
  0x52   : > { %817 = vmatpush.bf16.msrb.mxu0 %v1276_v63  ;;  %v1406_v63 = vld [vmem:[%s2115_s6 + $0xe8] sm:$0xf0] }
  0x53   : > { %691 = vmatpush.bf16.msra.mxu3 %v1216_v50  ;;  %v1409_v1 = vor.u32 %v1482_v61, %v1406_v63  ;;  %v1357_v50 = vor.u32 %v1471_v45, %v1356_v44 }
  0x54   : > { %831 = vmatmul.bf16.vlgmr.msrb.gmra.mxu1 %v707_v0  ;;  %678 = vmatpush.bf16.msra.mxu2 %v1212_v47 }
  0x55   : > { %818 = vmatmul.bf16.vlgmr.msrb.gmra.mxu0 %v707_v0 }
  0x57   : > { %964 = vmatpush.bf16.msrb.mxu3 %v1417_v56 }
  0x58   : > { %951 = vmatpush.bf16.msrb.mxu2 %v1413_v53 }
  0x5b   : > { %965 = vmatpush.bf16.msrb.mxu3 %v1409_v1 }
  0x5c   : > { %952 = vmatpush.bf16.msrb.mxu2 %v1405_v62 }
  0x5f   : > { %966 = vmatpush.bf16.msrb.mxu3 %v1401_v10 }
  0x60   : > { %953 = vmatpush.bf16.msrb.mxu2 %v1397_v8 }
  0x63   : > { %967 = vmatpush.bf16.msrb.mxu3 %v1393_v18 }
  0x64   : > { %954 = vmatpush.bf16.msrb.mxu2 %v1389_v15 }
  0x67   : > { %968 = vmatpush.bf16.msrb.mxu3 %v1385_v25 }
  0x68   : > { %955 = vmatpush.bf16.msrb.mxu2 %v1381_v23 }
  0x6b   : > { %969 = vmatpush.bf16.msrb.mxu3 %v1377_v34 }
  0x6c   : > { %956 = vmatpush.bf16.msrb.mxu2 %v1373_v31 }
  0x6f   : > { %970 = vmatpush.bf16.msrb.mxu3 %v1369_v41 }
  0x70   : > { %957 = vmatpush.bf16.msrb.mxu2 %v1365_v39 }
  0x73   : > { %971 = vmatpush.bf16.msrb.mxu3 %v1361_v52 }
  0x74   : > { %958 = vmatpush.bf16.msrb.mxu2 %v1357_v50 }
  0xb1   : > { %v552_v0 = vpop.f32.mrf.mxu1 }
  0xb2   : > { %v553_v2 = vadd.f32 %v552_v0, %v447_v55  ;;  %v539_v3 = vpop.f32.mrf.mxu0 }
  0xb3   : > { %v540_v35 = vadd.f32 %v539_v3, %v446_v27  ;;  %v1353_v27 = vld [vmem:[%s2116_s7 + $0x2] sm:$0x3] }
  0xb4   : > { %v557_v7 = vsub.f32 0.0, %v553_v2  ;;  %v726_v2 = vperm.slane %v724_v48, 0  ;;  %v868_v30 = vperm.slane %v1353_v27, 1  ;;  %v867_v41 = vperm.slane %v1353_v27, 0 }
  0xb5   : > { %v556_v42 = vmax.f32 %v540_v35, 0.0 }
  0xb6   : > { %v558_v11 = vmul.f32 1.442695, %v557_v7 }
  0xb8   : > { %1515 = vpow2.f32 %v558_v11 }
  0xb9   : > { %v554_v17 = vpop.f32.mrf.mxu1 }
  0xba   : > { %v541_v19 = vpop.f32.mrf.mxu0 }
  0xbe   : > { %v1516_v26 = vpop.eup %1515 }
  0xbf   : > { %v560_v28 = vadd.f32 1.0, %v1516_v26 }
  0xc1   : > { %1517 = vrcp.f32 %v560_v28 }
  0xc7   : > { %v1518_v43 = vpop.eup %1517 }
  0xc8   : > { %v563_v47 = vsub.f32 1.0, %v1518_v43  ;;  %v562_v49 = vmul.f32 %v1518_v43, %v1765_v60 }
  0xca   : > { %v564_v53 = vmul.f32 %v563_v47, %v556_v42 }
  0xcc   : > { %v565_v55 = vadd.f32 %v564_v53, %v562_v49 }
  0xce   : > { %v566_v57 = vpack.c.bf16 %v565_v55, %v565_v55 }
  0xd0   : > { %692 = vmatmul.bf16.vlgmr.msra.gmra.mxu3 %v566_v57  ;;  %679 = vmatmul.bf16.vlgmr.msra.gmra.mxu2 %v566_v57 }
  0xd1   : > { %v832_v56 = vpop.f32.mrf.mxu1 }
  0xd2   : > { %v833_v59 = vadd.f32 %v832_v56, %v727_v54  ;;  %v819_v61 = vpop.f32.mrf.mxu0 }
  0xd3   : > { %v820_v4 = vadd.f32 %v819_v61, %v726_v2 }
  0xd4   : > { %v837_v62 = vsub.f32 0.0, %v833_v59 }
  0xd5   : > { %v836_v5 = vmax.f32 %v820_v4, 0.0 }
  0xd6   : > { %v838_v60 = vmul.f32 1.442695, %v837_v62 }
  0xd8   : > { %1519 = vpow2.f32 %v838_v60 }
  0xd9   : > { %v834_v63 = vpop.f32.mrf.mxu1 }
  0xda   : > { %v821_v0 = vpop.f32.mrf.mxu0 }
  0xde   : > { %v1520_v1 = vpop.eup %1519 }
  0xdf   : > { %v840_v3 = vadd.f32 1.0, %v1520_v1 }
  0xe1   : > { %1521 = vrcp.f32 %v840_v3 }
  0xe7   : > { %v1522_v6 = vpop.eup %1521 }
  0xe8   : > { %v843_v7 = vsub.f32 1.0, %v1522_v6  ;;  %v842_v8 = vmul.f32 %v1522_v6, %v1879_v58 }
  0xea   : > { %v844_v9 = vmul.f32 %v843_v7, %v836_v5 }
  0xec   : > { %v845_v10 = vadd.f32 %v844_v9, %v842_v8 }
  0xee   : > { %v846_v11 = vpack.c.bf16 %v845_v10, %v845_v10 }
  0xf0   : > { %959 = vmatmul.bf16.vlgmr.msrb.gmra.mxu2 %v846_v11  ;;  %972 = vmatmul.bf16.vlgmr.msrb.gmra.mxu3 %v846_v11 }
 0x153   : > { %v693_v14 = vpop.f32.mrf.mxu3  ;;  %v680_v15 = vpop.f32.mrf.mxu2 }
 0x154   : > { %v694_v16 = vadd.f32 %v693_v14, %v588_v13  ;;  %v681_v23 = vadd.f32 %v680_v15, %v587_v22 }
 0x156   : > { %v698_v17 = vsub.f32 0.0, %v694_v16  ;;  %v697_v25 = vmax.f32 %v681_v23, 0.0 }
 0x158   : > { %v699_v18 = vmul.f32 1.442695, %v698_v17 }
 0x15a   : > { %1523 = vpow2.f32 %v699_v18 }
 0x15b   : > { %v682_v19 = vpop.f32.mrf.mxu2  ;;  %v695_v20 = vpop.f32.mrf.mxu3 }
 0x160   : > { %v1524_v58 = vpop.eup %1523 }
 0x161   : > { %v701_v21 = vadd.f32 1.0, %v1524_v58 }
 0x163   : > { %1525 = vrcp.f32 %v701_v21 }
 0x169   : > { %v1526_v24 = vpop.eup %1525 }
 0x16a   : > { %v704_v26 = vsub.f32 1.0, %v1526_v24  ;;  %v703_v28 = vmul.f32 %v1526_v24, %v565_v55 }
 0x16c   : > { %v705_v29 = vmul.f32 %v704_v26, %v697_v25 }
 0x16e   : > { %v706_v31 = vadd.f32 %v705_v29, %v703_v28 }
 0x170   : > { %987 = vst [vmem:[%s384_s24] sm:$0xff] %v706_v31 }
 0x173   : > { %v960_v32 = vpop.f32.mrf.mxu2  ;;  %v973_v33 = vpop.f32.mrf.mxu3 }
 0x174   : > { %v974_v34 = vadd.f32 %v973_v33, %v868_v30  ;;  %v961_v42 = vadd.f32 %v960_v32, %v867_v41 }
 0x176   : > { %v978_v35 = vsub.f32 0.0, %v974_v34  ;;  %v977_v44 = vmax.f32 %v961_v42, 0.0 }
 0x178   : > { %v979_v36 = vmul.f32 1.442695, %v978_v35 }
 0x17a   : > { %1527 = vpow2.f32 %v979_v36 }
 0x17b   : > { %v962_v37 = vpop.f32.mrf.mxu2  ;;  %v975_v38 = vpop.f32.mrf.mxu3 }
 0x180   : > { %v1528_v39 = vpop.eup %1527 }
 0x181   : > { %v981_v40 = vadd.f32 1.0, %v1528_v39 }
 0x183   : > { %1529 = vrcp.f32 %v981_v40 }
 0x189   : > { %v1530_v43 = vpop.eup %1529 }
 0x18a   : > { %v984_v45 = vsub.f32 1.0, %v1530_v43  ;;  %v983_v46 = vmul.f32 %v1530_v43, %v845_v10 }
 0x18c   : > { %v985_v47 = vmul.f32 %v984_v45, %v977_v44 }
 0x18e   : > { %v986_v48 = vadd.f32 %v985_v47, %v983_v46 }
 0x190   : > { %988 = vst [vmem:[%s388_s27] sm:$0xff] %v986_v48 }
 0x191 PF: > { %s22_s30 = sadd.s32 1, %s1575_s30  }
 0x192   : > { %p19_p7 = scmp.ge.s32.totalorder %s22_s30, 4  }
 0x194   :  { %21 = sbr.rel (!%p19_p7) target bundleno = 2 (0x2), region = 110 }
 0x199   :  { %1022 = vsyncpa [#allocation3], 1 }
 0x19a   :  { %1024 = vsyncpa [#allocation3 + $0x1], 1 }
 0x19b   :  { %1025 = vsyncpa [#allocation5], 1 }

// kernel: lbl_highway_bilm_forward.3
= control target key start
LH: loop header
LB: loop body
LE: loop exit
PB: predicated region body
PF: predicated region fallthrough
CT: control target
= control target key end

     0   :  { %15 = vsyncpa [#allocation3], 0  ;;  %s2119_s0 = inlined_call_operand.vmem [shape: f32[4], index: 0, kind: input, shape index: {}]   ;;  %s2120_s1 = inlined_call_operand.vmem [shape: f32[4], index: 1, kind: input, shape index: {}]   ;;  %s2121_s2 = inlined_call_operand.vmem [shape: f32[2,11,128], index: 2, kind: input, shape index: {}]   ;;  %s2122_s3 = inlined_call_operand.vmem [shape: f32[2,11,128], index: 3, kind: input, shape index: {}]   ;;  %s2123_s4 = inlined_call_operand.vmem [shape: bf16[2,128,256], index: 4, kind: input, shape index: {}]   ;;  %s2124_s5 = inlined_call_operand.vmem [shape: f32[2,1,256], index: 5, kind: input, shape index: {}]   ;;  %s2125_s6 = inlined_call_operand.vmem [shape: bf16[2,128,256], index: 6, kind: input, shape index: {}]   ;;  %s2126_s7 = inlined_call_operand.vmem [shape: f32[2,1,256], index: 7, kind: input, shape index: {}]   ;;  %s2127_s8 = inlined_call_operand.vmem [shape: f32[2,8,128], index: 8, kind: output, shape index: {0}]   ;;  %s2128_s9 = inlined_call_operand.vmem [shape: f32[2,8,128], index: 9, kind: output, shape index: {1}]  }
   0x1   :  { %16 = vsyncpa [#allocation5], 0  ;;  %s1631_s30 = smov 0  }
   0x2 LB: > { %s1637_s10 = sadd.s32 4294967295, %s1577_s30   ;;  %p1111_p0 = scmp.ge.s32.totalorder %s1577_s30, 1  ;;  %s1577_s30 = sphi %s1631_s30, %s22_s30  }
   0x3   : > { %p257_p1 = scmp.lt.s32.totalorder %s1577_s30, 3  ;;  %s269_s13 = sshll.u32 %s2119_s0, 4  ;;  %s270_s13 = int_to_ptr.vmem [resolvable:$true] %s269_s13 }
   0x4   : > { %p1503_p3 = scmp.eq.s32.totalorder %s1637_s10, 0  ;;  %s279_s16 = sshll.u32 %s2120_s1, 4  ;;  %s280_s16 = int_to_ptr.vmem [resolvable:$true] %s279_s16 }
   0x5   : > { %p258_p2 = pnand %p1111_p0, %p257_p1  ;;  %s1579_s17 = smov [#allocation2]  }
   0x6   : > { %s1580_s18 = smov [#allocation4]  }
   0x7   : > { %p1496_p4 = pneg %p258_p2 }
   0x8   : > { %320 = sbr.rel (%p258_p2) target bundleno = 403 (0x193), region = 52 }
   0x9   : > { %p1497_p5 = pnand %p1503_p3, %p1496_p4 }
   0xb   : > { %1499 = dma.vmem_to_smem (!%p1497_p5), %s270_s13, 16, %s1579_s17, [#allocation3]  }
   0xc   : > { %1502 = dma.vmem_to_smem (!%p1497_p5), %s280_s16, 16, %s1580_s18, [#allocation5]  }
   0xd   : > { %1568 = dma.done.wait (%p1503_p3), [#allocation3], 16  }
   0xe   : > { %1570 = vsyncadd (%p1503_p3), [#allocation3], 4294967280 }
   0xf   : > { %1572 = dma.done.wait (%p1503_p3), [#allocation5], 16  }
  0x10   : > { %1574 = vsyncadd (%p1503_p3), [#allocation5], 4294967280 }
  0x11   : > { %332 = sfence }
  0x12   : > { %v1438_v0 = vld [vmem:[%s2123_s4 + $0x74] sm:$0xf]  ;;  %v1190_v1 = vld [vmem:[%s2123_s4 + $0x78] sm:$0xf0]  ;;  %v1436_v2 = vld [vmem:[%s2123_s4 + $0x64] sm:$0xf] }
  0x13   : > { %v1193_v3 = vor.u32 %v1438_v0, %v1190_v1  ;;  %v1182_v4 = vld [vmem:[%s2123_s4 + $0x68] sm:$0xf0]  ;;  %v1188_v5 = vld [vmem:[%s2123_s4 + $0x70] sm:$0xf]  ;;  %v1439_v6 = vld [vmem:[%s2123_s4 + $0x74] sm:$0xf0] }
  0x14   : > { %v1185_v7 = vor.u32 %v1436_v2, %v1182_v4  ;;  %v1189_v8 = vor.u32 %v1439_v6, %v1188_v5  ;;  %v1180_v9 = vld [vmem:[%s2123_s4 + $0x60] sm:$0xf]  ;;  %v1437_v10 = vld [vmem:[%s2123_s4 + $0x64] sm:$0xf0]  ;;  %v1434_v11 = vld [vmem:[%s2123_s4 + $0x54] sm:$0xf] }
  0x15   : > { %543 = vmatpush.bf16.msra.mxu1 %v1193_v3  ;;  %v1174_v12 = vld [vmem:[%s2123_s4 + $0x58] sm:$0xf0]  ;;  %v1181_v13 = vor.u32 %v1437_v10, %v1180_v9  ;;  %v1172_v14 = vld [vmem:[%s2123_s4 + $0x50] sm:$0xf]  ;;  %v1435_v15 = vld [vmem:[%s2123_s4 + $0x54] sm:$0xf0] }
  0x16   : > { %530 = vmatpush.bf16.msra.mxu0 %v1189_v8  ;;  %v1177_v16 = vor.u32 %v1434_v11, %v1174_v12  ;;  %v1432_v17 = vld [vmem:[%s2123_s4 + $0x44] sm:$0xf]  ;;  %v1166_v18 = vld [vmem:[%s2123_s4 + $0x48] sm:$0xf0]  ;;  %v1173_v19 = vor.u32 %v1435_v15, %v1172_v14  ;;  %p371_p6 = scmp.lt.s32.totalorder %s1637_s10, 1  ;;  %s1124_s28 = sld [smem:[#allocation2 + $0x3]] }
  0x17   : > { %v1164_v20 = vld [vmem:[%s2123_s4 + $0x40] sm:$0xf]  ;;  %v1433_v21 = vld [vmem:[%s2123_s4 + $0x44] sm:$0xf0]  ;;  %s393_s14 = sld [smem:[#allocation2]]  ;;  %v1169_v22 = vor.u32 %v1432_v17, %v1166_v18 }
  0x18   : > { %s2130_s10 = smov (!%p371_p6, %s1637_s10), 1  ;;  %v1430_v23 = vld [vmem:[%s2123_s4 + $0x34] sm:$0xf]  ;;  %v1158_v24 = vld [vmem:[%s2123_s4 + $0x38] sm:$0xf0]  ;;  %s1125_s19 = sld [smem:[#allocation2 + $0x1]]  ;;  %v1165_v25 = vor.u32 %v1433_v21, %v1164_v20 }
  0x19   : > { %544 = vmatpush.bf16.msra.mxu1 %v1185_v7  ;;  %s1422_s20 = sshll.u32 %s2130_s10, 4  ;;  %s1717_s21 = sld [smem:[#allocation2 + $0x2]]  ;;  %v1156_v26 = vld [vmem:[%s2123_s4 + $0x30] sm:$0xf]  ;;  %v1431_v27 = vld [vmem:[%s2123_s4 + $0x34] sm:$0xf0]  ;;  %v1161_v28 = vor.u32 %v1430_v23, %v1158_v24 }
  0x1a   : > { %531 = vmatpush.bf16.msra.mxu0 %v1181_v13  ;;  %s375_s29 = scalar_lea.vmem %s2121_s2, %s1422_s20  ;;  %v1428_v32 = vld [vmem:[%s2123_s4 + $0x24] sm:$0xf]  ;;  %v1150_v33 = vld [vmem:[%s2123_s4 + $0x28] sm:$0xf0]  ;;  %v1157_v37 = vor.u32 %v1431_v27, %v1156_v26  ;;  %v1148_v40 = vld [vmem:[%s2123_s4 + $0x20] sm:$0xf] }
  0x1b   : > { %v1730_v29 = vld [vmem:[%s375_s29 + $0x3] sm:$0xff]  ;;  %v1153_v42 = vor.u32 %v1428_v32, %v1150_v33  ;;  %v1426_v47 = vld [vmem:[%s2123_s4 + $0x14] sm:$0xf]  ;;  %v1142_v48 = vld [vmem:[%s2123_s4 + $0x18] sm:$0xf0]  ;;  %s1798_s16 = sld [smem:[#allocation4]] }
  0x1c   : > { %v391_v30 = vstv %s1124_s28  ;;  %v394_v31 = vld [vmem:[%s375_s29] sm:$0xff]  ;;  %v1429_v41 = vld [vmem:[%s2123_s4 + $0x24] sm:$0xf0]  ;;  %v1140_v52 = vld [vmem:[%s2123_s4 + $0x10] sm:$0xf]  ;;  %v1145_v54 = vor.u32 %v1426_v47, %v1142_v48  ;;  %s1800_s28 = sld [smem:[#allocation4 + $0x1]] }
  0x1d   : > { %545 = vmatpush.bf16.msra.mxu1 %v1177_v16  ;;  %v392_v34 = vmul.f32 %v391_v30, %v1730_v29  ;;  %v395_v35 = vstv %s393_s14  ;;  %v399_v36 = vld [vmem:[%s375_s29 + $0x1] sm:$0xff]  ;;  %v1149_v49 = vor.u32 %v1429_v41, %v1148_v40  ;;  %v1427_v53 = vld [vmem:[%s2123_s4 + $0x14] sm:$0xf0]  ;;  %v1134_v56 = vld [vmem:[%s2123_s4 + $0x8] sm:$0xf0]  ;;  %s1814_s26 = sld [smem:[#allocation4 + $0x2]] }
  0x1e   : > { %532 = vmatpush.bf16.msra.mxu0 %v1173_v19  ;;  %v396_v38 = vmul.f32 %v395_v35, %v394_v31  ;;  %v400_v39 = vstv %s1125_s19  ;;  %v404_v45 = vld [vmem:[%s375_s29 + $0x2] sm:$0xff]  ;;  %v1470_v57 = vld [vmem:[%s2125_s6 + $0x74] sm:$0xf]  ;;  %v1335_v58 = vld [vmem:[%s2125_s6 + $0x78] sm:$0xf0]  ;;  %v1141_v59 = vor.u32 %v1427_v53, %v1140_v52  ;;  %s1821_s29 = scalar_lea.vmem %s2122_s3, %s1422_s20  ;;  %s1129_s20 = sld [smem:[#allocation4 + $0x3]] }
  0x1f   : > { %v401_v44 = vmul.f32 %v400_v39, %v399_v36  ;;  %v405_v46 = vstv %s1717_s21  ;;  %v1424_v55 = vld [vmem:[%s2123_s4 + $0x4] sm:$0xf]  ;;  %v1132_v61 = vld [vmem:[%s2123_s4] sm:$0xf]  ;;  %v1425_v62 = vld [vmem:[%s2123_s4 + $0x4] sm:$0xf0]  ;;  %v1338_v2 = vor.u32 %v1470_v57, %v1335_v58 }
  0x20   : > { %v397_v43 = vadd.f32 %v396_v38, %v392_v34  ;;  %v406_v51 = vmul.f32 %v405_v46, %v404_v45  ;;  %v1137_v63 = vor.u32 %v1424_v55, %v1134_v56  ;;  %v1333_v0 = vld [vmem:[%s2125_s6 + $0x70] sm:$0xf]  ;;  %v1471_v1 = vld [vmem:[%s2125_s6 + $0x74] sm:$0xf0]  ;;  %v1468_v3 = vld [vmem:[%s2125_s6 + $0x64] sm:$0xf]  ;;  %v1133_v5 = vor.u32 %v1425_v62, %v1132_v61 }
  0x21   : > { %546 = vmatpush.bf16.msra.mxu1 %v1169_v22  ;;  %v1327_v4 = vld [vmem:[%s2125_s6 + $0x68] sm:$0xf0]  ;;  %v1334_v7 = vor.u32 %v1471_v1, %v1333_v0  ;;  %v1325_v8 = vld [vmem:[%s2125_s6 + $0x60] sm:$0xf]  ;;  %v1469_v9 = vld [vmem:[%s2125_s6 + $0x64] sm:$0xf0]  ;;  %v410_v24 = vstv %s1798_s16 }
  0x22   : > { %533 = vmatpush.bf16.msra.mxu0 %v1165_v25  ;;  %v402_v50 = vadd.f32 %v401_v44, %v397_v43  ;;  %v1330_v10 = vor.u32 %v1468_v3, %v1327_v4  ;;  %v1466_v11 = vld [vmem:[%s2125_s6 + $0x54] sm:$0xf]  ;;  %v1319_v12 = vld [vmem:[%s2125_s6 + $0x58] sm:$0xf0]  ;;  %v1326_v13 = vor.u32 %v1469_v9, %v1325_v8  ;;  %v1317_v14 = vld [vmem:[%s2125_s6 + $0x50] sm:$0xf]  ;;  %v414_v26 = vstv %s1800_s28 }
  0x23   : > { %v1467_v15 = vld [vmem:[%s2125_s6 + $0x54] sm:$0xf0]  ;;  %v1322_v16 = vor.u32 %v1466_v11, %v1319_v12  ;;  %v1464_v17 = vld [vmem:[%s2125_s6 + $0x44] sm:$0xf]  ;;  %v1311_v18 = vld [vmem:[%s2125_s6 + $0x48] sm:$0xf0] }
  0x24   : > { %v1770_v60 = vadd.f32 %v406_v51, %v402_v50  ;;  %v1318_v19 = vor.u32 %v1467_v15, %v1317_v14  ;;  %v1309_v20 = vld [vmem:[%s2125_s6 + $0x40] sm:$0xf]  ;;  %v1465_v21 = vld [vmem:[%s2125_s6 + $0x44] sm:$0xf0]  ;;  %v1314_v22 = vor.u32 %v1464_v17, %v1311_v18  ;;  %v1462_v27 = vld [vmem:[%s2125_s6 + $0x34] sm:$0xf]  ;;  %v424_v47 = vstv %s1129_s20 }
  0x25   : > { %547 = vmatpush.bf16.msra.mxu1 %v1161_v28  ;;  %v1836_v23 = vld [vmem:[%s1821_s29] sm:$0xff]  ;;  %v1303_v28 = vld [vmem:[%s2125_s6 + $0x38] sm:$0xf0]  ;;  %v1310_v30 = vor.u32 %v1465_v21, %v1309_v20  ;;  %v1301_v31 = vld [vmem:[%s2125_s6 + $0x30] sm:$0xf] }
  0x26   : > { %534 = vmatpush.bf16.msra.mxu0 %v1157_v37  ;;  %v427_v6 = vpack.c.bf16 %v1770_v60, %v1770_v60  ;;  %v413_v25 = vld [vmem:[%s1821_s29 + $0x1] sm:$0xff]  ;;  %v1463_v32 = vld [vmem:[%s2125_s6 + $0x34] sm:$0xf0]  ;;  %v411_v33 = vmul.f32 %v410_v24, %v1836_v23  ;;  %v1306_v35 = vor.u32 %v1462_v27, %v1303_v28  ;;  %v419_v37 = vstv %s1814_s26  ;;  %v1295_v39 = vld [vmem:[%s2125_s6 + $0x28] sm:$0xf0]  ;;  %s1122_s26 = sshll.u32 %s2130_s10, 3 }
  0x27   : > { %v415_v34 = vmul.f32 %v414_v26, %v413_v25  ;;  %v418_v36 = vld [vmem:[%s1821_s29 + $0x2] sm:$0xff]  ;;  %v1302_v40 = vor.u32 %v1463_v32, %v1301_v31  ;;  %v1458_v48 = vld [vmem:[%s2125_s6 + $0x14] sm:$0xf]  ;;  %v1285_v53 = vld [vmem:[%s2125_s6 + $0x10] sm:$0xf]  ;;  %s384_s24 = scalar_lea.vmem %s2127_s8, %s1122_s26  ;;  %s388_s27 = scalar_lea.vmem %s2128_s9, %s1122_s26 }
  0x28   : > { %v1460_v38 = vld [vmem:[%s2125_s6 + $0x24] sm:$0xf]  ;;  %v1293_v43 = vld [vmem:[%s2125_s6 + $0x20] sm:$0xf]  ;;  %v1461_v44 = vld [vmem:[%s2125_s6 + $0x24] sm:$0xf0] }
  0x29   : > { %548 = vmatpush.bf16.msra.mxu1 %v1153_v42  ;;  %v416_v41 = vadd.f32 %v415_v34, %v411_v33  ;;  %v420_v42 = vmul.f32 %v419_v37, %v418_v36  ;;  %v1298_v45 = vor.u32 %v1460_v38, %v1295_v39  ;;  %v423_v46 = vld [vmem:[%s1821_s29 + $0x3] sm:$0xff]  ;;  %v1294_v50 = vor.u32 %v1461_v44, %v1293_v43  ;;  %v1279_v57 = vld [vmem:[%s2125_s6 + $0x8] sm:$0xf0]  ;;  %v1455_v3 = vld [vmem:[%s2123_s4 + $0xf4] sm:$0xf0] }
  0x2a   : > { %535 = vmatpush.bf16.msra.mxu0 %v1149_v49  ;;  %v1287_v49 = vld [vmem:[%s2125_s6 + $0x18] sm:$0xf0]  ;;  %v425_v52 = vmul.f32 %v424_v47, %v423_v46  ;;  %v1456_v56 = vld [vmem:[%s2125_s6 + $0x4] sm:$0xf]  ;;  %v1277_v61 = vld [vmem:[%s2125_s6] sm:$0xf] }
  0x2b   : > { %v421_v51 = vadd.f32 %v420_v42, %v416_v41  ;;  %v1290_v55 = vor.u32 %v1458_v48, %v1287_v49  ;;  %v1457_v62 = vld [vmem:[%s2125_s6 + $0x4] sm:$0xf0]  ;;  %v1454_v4 = vld [vmem:[%s2123_s4 + $0xf4] sm:$0xf]  ;;  %v1261_v8 = vld [vmem:[%s2123_s4 + $0xe0] sm:$0xf] }
  0x2c   : > { %v1278_v0 = vor.u32 %v1457_v62, %v1277_v61  ;;  %v1453_v9 = vld [vmem:[%s2123_s4 + $0xe4] sm:$0xf0]  ;;  %v1263_v12 = vld [vmem:[%s2123_s4 + $0xe8] sm:$0xf0]  ;;  %v1253_v14 = vld [vmem:[%s2123_s4 + $0xd0] sm:$0xf] }
  0x2d   : > { %549 = vmatpush.bf16.msra.mxu1 %v1145_v54  ;;  %v1459_v54 = vld [vmem:[%s2125_s6 + $0x14] sm:$0xf0]  ;;  %v1262_v11 = vor.u32 %v1453_v9, %v1261_v8  ;;  %v1255_v18 = vld [vmem:[%s2123_s4 + $0xd8] sm:$0xf0]  ;;  %v1245_v20 = vld [vmem:[%s2123_s4 + $0xc0] sm:$0xf] }
  0x2e   : > { %536 = vmatpush.bf16.msra.mxu0 %v1141_v59  ;;  %v1286_v58 = vor.u32 %v1459_v54, %v1285_v53  ;;  %v1887_v59 = vadd.f32 %v425_v52, %v421_v51  ;;  %v1451_v15 = vld [vmem:[%s2123_s4 + $0xd4] sm:$0xf0]  ;;  %v1449_v21 = vld [vmem:[%s2123_s4 + $0xc4] sm:$0xf0]  ;;  %v1247_v25 = vld [vmem:[%s2123_s4 + $0xc8] sm:$0xf0] }
  0x2f   : > { %v1254_v17 = vor.u32 %v1451_v15, %v1253_v14  ;;  %v1246_v24 = vor.u32 %v1449_v21, %v1245_v20  ;;  %v1237_v27 = vld [vmem:[%s2123_s4 + $0xb0] sm:$0xf]  ;;  %v1447_v28 = vld [vmem:[%s2123_s4 + $0xb4] sm:$0xf0]  ;;  %v1239_v32 = vld [vmem:[%s2123_s4 + $0xb8] sm:$0xf0] }
  0x30   : > { %v707_v1 = vpack.c.bf16 %v1887_v59, %v1887_v59  ;;  %v1238_v31 = vor.u32 %v1447_v28, %v1237_v27  ;;  %v1229_v34 = vld [vmem:[%s2123_s4 + $0xa0] sm:$0xf]  ;;  %v1444_v36 = vld [vmem:[%s2123_s4 + $0xa4] sm:$0xf]  ;;  %v1231_v38 = vld [vmem:[%s2123_s4 + $0xa8] sm:$0xf0] }
  0x31   : > { %550 = vmatpush.bf16.msra.mxu1 %v1137_v63  ;;  %v1282_v63 = vor.u32 %v1456_v56, %v1279_v57  ;;  %v1234_v39 = vor.u32 %v1444_v36, %v1231_v38  ;;  %v1443_v41 = vld [vmem:[%s2123_s4 + $0x94] sm:$0xf0]  ;;  %v1442_v42 = vld [vmem:[%s2123_s4 + $0x94] sm:$0xf]  ;;  %v1223_v44 = vld [vmem:[%s2123_s4 + $0x98] sm:$0xf0] }
  0x32   : > { %537 = vmatpush.bf16.msra.mxu0 %v1133_v5  ;;  %v1213_v46 = vld [vmem:[%s2123_s4 + $0x80] sm:$0xf]  ;;  %v1441_v47 = vld [vmem:[%s2123_s4 + $0x84] sm:$0xf0]  ;;  %v1440_v48 = vld [vmem:[%s2123_s4 + $0x84] sm:$0xf] }
  0x33   : > { %v1993_v49 = vld [vmem:[%s2124_s5] sm:$0x3]  ;;  %v1215_v51 = vld [vmem:[%s2123_s4 + $0x88] sm:$0xf0]  ;;  %v1414_v52 = vld [vmem:[%s2125_s6 + $0xf0] sm:$0xf] }
  0x34   : > { %551 = vmatmul.bf16.vlgmr.msra.gmra.mxu1 %v427_v6  ;;  %v1218_v53 = vor.u32 %v1440_v48, %v1215_v51  ;;  %v1487_v54 = vld [vmem:[%s2125_s6 + $0xf4] sm:$0xf0]  ;;  %v1416_v57 = vld [vmem:[%s2125_s6 + $0xf8] sm:$0xf0]  ;;  %v1406_v62 = vld [vmem:[%s2125_s6 + $0xe0] sm:$0xf] }
  0x35   : > { %823 = vmatpush.bf16.msrb.mxu1 %v1338_v2  ;;  %538 = vmatmul.bf16.vlgmr.msra.gmra.mxu0 %v427_v6  ;;  %v1269_v2 = vld [vmem:[%s2123_s4 + $0xf0] sm:$0xf]  ;;  %v1271_v6 = vld [vmem:[%s2123_s4 + $0xf8] sm:$0xf0]  ;;  %v1415_v56 = vor.u32 %v1487_v54, %v1414_v52  ;;  %v1483_v8 = vld [vmem:[%s2125_s6 + $0xd4] sm:$0xf0] }
  0x36   : > { %810 = vmatpush.bf16.msrb.mxu0 %v1334_v7  ;;  %v1270_v5 = vor.u32 %v1455_v3, %v1269_v2  ;;  %v1274_v7 = vor.u32 %v1454_v4, %v1271_v6  ;;  %v1408_v2 = vld [vmem:[%s2125_s6 + $0xe8] sm:$0xf0]  ;;  %v1482_v9 = vld [vmem:[%s2125_s6 + $0xd4] sm:$0xf]  ;;  %v1390_v15 = vld [vmem:[%s2125_s6 + $0xc0] sm:$0xf] }
  0x37   : > { %v1384_v28 = vld [vmem:[%s2125_s6 + $0xb8] sm:$0xf0]  ;;  %v1376_v38 = vld [vmem:[%s2125_s6 + $0xa8] sm:$0xf0]  ;;  %v1472_v51 = vld [vmem:[%s2125_s6 + $0x84] sm:$0xf] }
  0x38   : > { %671 = vmatpush.bf16.msra.mxu2 %v1270_v5  ;;  %684 = vmatpush.bf16.msra.mxu3 %v1274_v7  ;;  %v1398_v7 = vld [vmem:[%s2125_s6 + $0xd0] sm:$0xf] }
  0x39   : > { %824 = vmatpush.bf16.msrb.mxu1 %v1330_v10  ;;  %v1452_v10 = vld [vmem:[%s2123_s4 + $0xe4] sm:$0xf] }
  0x3a   : > { %811 = vmatpush.bf16.msrb.mxu0 %v1326_v13  ;;  %v1266_v13 = vor.u32 %v1452_v10, %v1263_v12  ;;  %v1400_v12 = vld [vmem:[%s2125_s6 + $0xd8] sm:$0xf0] }
  0x3c   : > { %672 = vmatpush.bf16.msra.mxu2 %v1262_v11  ;;  %685 = vmatpush.bf16.msra.mxu3 %v1266_v13  ;;  %v1399_v11 = vor.u32 %v1483_v8, %v1398_v7  ;;  %v1403_v13 = vor.u32 %v1482_v9, %v1400_v12 }
  0x3d   : > { %825 = vmatpush.bf16.msrb.mxu1 %v1322_v16  ;;  %v1450_v16 = vld [vmem:[%s2123_s4 + $0xd4] sm:$0xf] }
  0x3e   : > { %812 = vmatpush.bf16.msrb.mxu0 %v1318_v19  ;;  %v1258_v19 = vor.u32 %v1450_v16, %v1255_v18  ;;  %v1481_v16 = vld [vmem:[%s2125_s6 + $0xc4] sm:$0xf0] }
  0x3f   : > { %v1391_v18 = vor.u32 %v1481_v16, %v1390_v15 }
  0x40   : > { %673 = vmatpush.bf16.msra.mxu2 %v1254_v17  ;;  %686 = vmatpush.bf16.msra.mxu3 %v1258_v19  ;;  %v1480_v17 = vld [vmem:[%s2125_s6 + $0xc4] sm:$0xf]  ;;  %v1392_v19 = vld [vmem:[%s2125_s6 + $0xc8] sm:$0xf0] }
  0x41   : > { %826 = vmatpush.bf16.msrb.mxu1 %v1314_v22  ;;  %v1448_v22 = vld [vmem:[%s2123_s4 + $0xc4] sm:$0xf]  ;;  %v1395_v21 = vor.u32 %v1480_v17, %v1392_v19  ;;  %v1210_v17 = vld [vmem:[%s2124_s5 + $0x2] sm:$0x3] }
  0x42   : > { %813 = vmatpush.bf16.msrb.mxu0 %v1310_v30  ;;  %v1250_v26 = vor.u32 %v1448_v22, %v1247_v25  ;;  %v1446_v30 = vld [vmem:[%s2123_s4 + $0xb4] sm:$0xf]  ;;  %v1479_v25 = vld [vmem:[%s2125_s6 + $0xb4] sm:$0xf0] }
  0x43   : > { %v1242_v33 = vor.u32 %v1446_v30, %v1239_v32  ;;  %v446_v32 = vperm.slane %v1993_v49, 0 }
  0x44   : > { %674 = vmatpush.bf16.msra.mxu2 %v1246_v24  ;;  %687 = vmatpush.bf16.msra.mxu3 %v1250_v26  ;;  %v1382_v24 = vld [vmem:[%s2125_s6 + $0xb0] sm:$0xf]  ;;  %v1478_v26 = vld [vmem:[%s2125_s6 + $0xb4] sm:$0xf] }
  0x45   : > { %827 = vmatpush.bf16.msrb.mxu1 %v1306_v35  ;;  %v1445_v35 = vld [vmem:[%s2123_s4 + $0xa4] sm:$0xf0]  ;;  %v1383_v27 = vor.u32 %v1479_v25, %v1382_v24  ;;  %v1387_v30 = vor.u32 %v1478_v26, %v1384_v28  ;;  %v587_v28 = vperm.slane %v1210_v17, 0 }
  0x46   : > { %814 = vmatpush.bf16.msrb.mxu0 %v1302_v40  ;;  %v1230_v37 = vor.u32 %v1445_v35, %v1229_v34  ;;  %v1221_v40 = vld [vmem:[%s2123_s4 + $0x90] sm:$0xf]  ;;  %v1374_v34 = vld [vmem:[%s2125_s6 + $0xa0] sm:$0xf]  ;;  %v1477_v35 = vld [vmem:[%s2125_s6 + $0xa4] sm:$0xf0] }
  0x47   : > { %v1222_v43 = vor.u32 %v1443_v41, %v1221_v40  ;;  %v1375_v36 = vor.u32 %v1477_v35, %v1374_v34  ;;  %v1366_v41 = vld [vmem:[%s2125_s6 + $0x90] sm:$0xf]  ;;  %v1355_v34 = vld [vmem:[%s2126_s7 + $0x2] sm:$0x3] }
  0x48   : > { %675 = vmatpush.bf16.msra.mxu2 %v1238_v31  ;;  %688 = vmatpush.bf16.msra.mxu3 %v1242_v33 }
  0x49   : > { %828 = vmatpush.bf16.msrb.mxu1 %v1298_v45  ;;  %v1226_v45 = vor.u32 %v1442_v42, %v1223_v44  ;;  %v1475_v42 = vld [vmem:[%s2125_s6 + $0x94] sm:$0xf0] }
  0x4a   : > { %815 = vmatpush.bf16.msrb.mxu0 %v1294_v50  ;;  %v1214_v50 = vor.u32 %v1441_v47, %v1213_v46  ;;  %v1367_v44 = vor.u32 %v1475_v42, %v1366_v41 }
  0x4c   : > { %676 = vmatpush.bf16.msra.mxu2 %v1230_v37  ;;  %689 = vmatpush.bf16.msra.mxu3 %v1234_v39  ;;  %v1476_v37 = vld [vmem:[%s2125_s6 + $0xa4] sm:$0xf] }
  0x4d   : > { %829 = vmatpush.bf16.msrb.mxu1 %v1290_v55  ;;  %v1486_v55 = vld [vmem:[%s2125_s6 + $0xf4] sm:$0xf]  ;;  %v1379_v39 = vor.u32 %v1476_v37, %v1376_v38  ;;  %v868_v37 = vperm.slane %v1355_v34, 1 }
  0x4e   : > { %816 = vmatpush.bf16.msrb.mxu0 %v1286_v58  ;;  %v447_v58 = vperm.slane %v1993_v49, 1  ;;  %v1419_v61 = vor.u32 %v1486_v55, %v1416_v57  ;;  %v1358_v49 = vld [vmem:[%s2125_s6 + $0x80] sm:$0xf] }
  0x50   : > { %677 = vmatpush.bf16.msra.mxu2 %v1222_v43  ;;  %690 = vmatpush.bf16.msra.mxu3 %v1226_v45  ;;  %v1474_v43 = vld [vmem:[%s2125_s6 + $0x94] sm:$0xf]  ;;  %v1368_v45 = vld [vmem:[%s2125_s6 + $0x98] sm:$0xf0] }
  0x51   : > { %830 = vmatpush.bf16.msrb.mxu1 %v1282_v63  ;;  %v1485_v63 = vld [vmem:[%s2125_s6 + $0xe4] sm:$0xf0]  ;;  %v1371_v46 = vor.u32 %v1474_v43, %v1368_v45 }
  0x52   : > { %817 = vmatpush.bf16.msrb.mxu0 %v1278_v0  ;;  %v1484_v0 = vld [vmem:[%s2125_s6 + $0xe4] sm:$0xf] }
  0x53   : > { %v1411_v4 = vor.u32 %v1484_v0, %v1408_v2 }
  0x54   : > { %831 = vmatmul.bf16.vlgmr.msrb.gmra.mxu1 %v707_v1  ;;  %678 = vmatpush.bf16.msra.mxu2 %v1214_v50  ;;  %v1473_v50 = vld [vmem:[%s2125_s6 + $0x84] sm:$0xf0] }
  0x55   : > { %818 = vmatmul.bf16.vlgmr.msrb.gmra.mxu0 %v707_v1  ;;  %691 = vmatpush.bf16.msra.mxu3 %v1218_v53  ;;  %v1407_v1 = vor.u32 %v1485_v63, %v1406_v62  ;;  %v724_v53 = vld [vmem:[%s2126_s7] sm:$0x3]  ;;  %v1359_v55 = vor.u32 %v1473_v50, %v1358_v49  ;;  %v867_v49 = vperm.slane %v1355_v34, 0 }
  0x56   : > { %v726_v7 = vperm.slane %v724_v53, 0 }
  0x58   : > { %951 = vmatpush.bf16.msrb.mxu2 %v1415_v56  ;;  %v1360_v56 = vld [vmem:[%s2125_s6 + $0x88] sm:$0xf0] }
  0x59   : > { %964 = vmatpush.bf16.msrb.mxu3 %v1419_v61  ;;  %v1363_v57 = vor.u32 %v1472_v51, %v1360_v56  ;;  %v727_v61 = vperm.slane %v724_v53, 1 }
  0x5c   : > { %952 = vmatpush.bf16.msrb.mxu2 %v1407_v1 }
  0x5d   : > { %965 = vmatpush.bf16.msrb.mxu3 %v1411_v4 }
  0x60   : > { %953 = vmatpush.bf16.msrb.mxu2 %v1399_v11 }
  0x61   : > { %966 = vmatpush.bf16.msrb.mxu3 %v1403_v13 }
  0x64   : > { %954 = vmatpush.bf16.msrb.mxu2 %v1391_v18  ;;  %v588_v18 = vperm.slane %v1210_v17, 1 }
  0x65   : > { %967 = vmatpush.bf16.msrb.mxu3 %v1395_v21 }
  0x68   : > { %955 = vmatpush.bf16.msrb.mxu2 %v1383_v27 }
  0x69   : > { %968 = vmatpush.bf16.msrb.mxu3 %v1387_v30 }
  0x6c   : > { %956 = vmatpush.bf16.msrb.mxu2 %v1375_v36 }
  0x6d   : > { %969 = vmatpush.bf16.msrb.mxu3 %v1379_v39 }
  0x70   : > { %957 = vmatpush.bf16.msrb.mxu2 %v1367_v44 }
  0x71   : > { %970 = vmatpush.bf16.msrb.mxu3 %v1371_v46 }
  0x74   : > { %958 = vmatpush.bf16.msrb.mxu2 %v1359_v55 }
  0x75   : > { %971 = vmatpush.bf16.msrb.mxu3 %v1363_v57 }
  0xb1   : > { %v552_v3 = vpop.f32.mrf.mxu1 }
  0xb2   : > { %v553_v5 = vadd.f32 %v552_v3, %v447_v58  ;;  %v539_v6 = vpop.f32.mrf.mxu0 }
  0xb3   : > { %v540_v40 = vadd.f32 %v539_v6, %v446_v32 }
  0xb4   : > { %v557_v10 = vsub.f32 0.0, %v553_v5 }
  0xb5   : > { %v556_v47 = vmax.f32 %v540_v40, 0.0 }
  0xb6   : > { %v558_v14 = vmul.f32 1.442695, %v557_v10 }
  0xb8   : > { %1517 = vpow2.f32 %v558_v14 }
  0xb9   : > { %v554_v20 = vpop.f32.mrf.mxu1 }
  0xba   : > { %v541_v22 = vpop.f32.mrf.mxu0 }
  0xbe   : > { %v1518_v31 = vpop.eup %1517 }
  0xbf   : > { %v560_v33 = vadd.f32 1.0, %v1518_v31 }
  0xc1   : > { %1519 = vrcp.f32 %v560_v33 }
  0xc7   : > { %v1520_v48 = vpop.eup %1519 }
  0xc8   : > { %v563_v52 = vsub.f32 1.0, %v1520_v48  ;;  %v562_v54 = vmul.f32 %v1520_v48, %v1770_v60 }
  0xca   : > { %v564_v58 = vmul.f32 %v563_v52, %v556_v47 }
  0xcc   : > { %v565_v62 = vadd.f32 %v564_v58, %v562_v54 }
  0xce   : > { %v566_v0 = vpack.c.bf16 %v565_v62, %v565_v62 }
  0xd0   : > { %692 = vmatmul.bf16.vlgmr.msra.gmra.mxu3 %v566_v0  ;;  %679 = vmatmul.bf16.vlgmr.msra.gmra.mxu2 %v566_v0 }
  0xd1   : > { %v832_v63 = vpop.f32.mrf.mxu1 }
  0xd2   : > { %v833_v1 = vadd.f32 %v832_v63, %v727_v61  ;;  %v819_v2 = vpop.f32.mrf.mxu0 }
  0xd3   : > { %v820_v9 = vadd.f32 %v819_v2, %v726_v7 }
  0xd4   : > { %v837_v3 = vsub.f32 0.0, %v833_v1 }
  0xd5   : > { %v836_v10 = vmax.f32 %v820_v9, 0.0 }
  0xd6   : > { %v838_v60 = vmul.f32 1.442695, %v837_v3 }
  0xd8   : > { %1521 = vpow2.f32 %v838_v60 }
  0xd9   : > { %v834_v4 = vpop.f32.mrf.mxu1 }
  0xda   : > { %v821_v5 = vpop.f32.mrf.mxu0 }
  0xde   : > { %v1522_v6 = vpop.eup %1521 }
  0xdf   : > { %v840_v8 = vadd.f32 1.0, %v1522_v6 }
  0xe1   : > { %1523 = vrcp.f32 %v840_v8 }
  0xe7   : > { %v1524_v11 = vpop.eup %1523 }
  0xe8   : > { %v843_v12 = vsub.f32 1.0, %v1524_v11  ;;  %v842_v13 = vmul.f32 %v1524_v11, %v1887_v59 }
  0xea   : > { %v844_v14 = vmul.f32 %v843_v12, %v836_v10 }
  0xec   : > { %v845_v15 = vadd.f32 %v844_v14, %v842_v13 }
  0xee   : > { %v846_v16 = vpack.c.bf16 %v845_v15, %v845_v15 }
  0xf0   : > { %959 = vmatmul.bf16.vlgmr.msrb.gmra.mxu2 %v846_v16  ;;  %972 = vmatmul.bf16.vlgmr.msrb.gmra.mxu3 %v846_v16 }
 0x153   : > { %v693_v19 = vpop.f32.mrf.mxu3  ;;  %v680_v20 = vpop.f32.mrf.mxu2 }
 0x154   : > { %v694_v21 = vadd.f32 %v693_v19, %v588_v18  ;;  %v681_v30 = vadd.f32 %v680_v20, %v587_v28 }
 0x156   : > { %v698_v22 = vsub.f32 0.0, %v694_v21  ;;  %v697_v32 = vmax.f32 %v681_v30, 0.0 }
 0x158   : > { %v699_v24 = vmul.f32 1.442695, %v698_v22 }
 0x15a   : > { %1525 = vpow2.f32 %v699_v24 }
 0x15b   : > { %v682_v25 = vpop.f32.mrf.mxu2  ;;  %v695_v26 = vpop.f32.mrf.mxu3 }
 0x160   : > { %v1526_v59 = vpop.eup %1525 }
 0x161   : > { %v701_v27 = vadd.f32 1.0, %v1526_v59 }
 0x163   : > { %1527 = vrcp.f32 %v701_v27 }
 0x169   : > { %v1528_v31 = vpop.eup %1527 }
 0x16a   : > { %v704_v33 = vsub.f32 1.0, %v1528_v31  ;;  %v703_v35 = vmul.f32 %v1528_v31, %v565_v62 }
 0x16c   : > { %v705_v36 = vmul.f32 %v704_v33, %v697_v32 }
 0x16e   : > { %v706_v38 = vadd.f32 %v705_v36, %v703_v35 }
 0x170   : > { %v987_v39 = vadd.f32 %v706_v38, %v1730_v29 }
 0x172   : > { %989 = vst [vmem:[%s384_s24] sm:$0xff] %v987_v39 }
 0x173   : > { %v960_v40 = vpop.f32.mrf.mxu2  ;;  %v973_v41 = vpop.f32.mrf.mxu3 }
 0x174   : > { %v974_v42 = vadd.f32 %v973_v41, %v868_v37  ;;  %v961_v50 = vadd.f32 %v960_v40, %v867_v49 }
 0x176   : > { %v978_v43 = vsub.f32 0.0, %v974_v42  ;;  %v977_v52 = vmax.f32 %v961_v50, 0.0 }
 0x178   : > { %v979_v44 = vmul.f32 1.442695, %v978_v43 }
 0x17a   : > { %1529 = vpow2.f32 %v979_v44 }
 0x17b   : > { %v962_v45 = vpop.f32.mrf.mxu2  ;;  %v975_v46 = vpop.f32.mrf.mxu3 }
 0x180   : > { %v1530_v47 = vpop.eup %1529 }
 0x181   : > { %v981_v48 = vadd.f32 1.0, %v1530_v47 }
 0x183   : > { %1531 = vrcp.f32 %v981_v48 }
 0x189   : > { %v1532_v51 = vpop.eup %1531 }
 0x18a   : > { %v984_v53 = vsub.f32 1.0, %v1532_v51  ;;  %v983_v54 = vmul.f32 %v1532_v51, %v845_v15 }
 0x18c   : > { %v985_v55 = vmul.f32 %v984_v53, %v977_v52 }
 0x18e   : > { %v986_v29 = vadd.f32 %v985_v55, %v983_v54 }
 0x190   : > { %v988_v56 = vadd.f32 %v986_v29, %v1836_v23 }
 0x192   : > { %990 = vst [vmem:[%s388_s27] sm:$0xff] %v988_v56 }
 0x193 PF: > { %s22_s30 = sadd.s32 1, %s1577_s30  }
 0x194   : > { %p19_p7 = scmp.ge.s32.totalorder %s22_s30, 4  }
 0x196   :  { %21 = sbr.rel (!%p19_p7) target bundleno = 2 (0x2), region = 110 }
 0x19b   :  { %1024 = vsyncpa [#allocation3], 1 }
 0x19c   :  { %1026 = vsyncpa [#allocation3 + $0x1], 1 }
 0x19d   :  { %1027 = vsyncpa [#allocation5], 1 }

</bundles_post_ra>
